<compile_context>
chip_gen: v7x
topology: tpu7x:2x2x1
jax: 0.10.0
libtpu: 0.0.40
codegen_flags: <defaults>
</compile_context>

<pallas_src>
import functools

import jax
import jax.numpy as jnp
from jax.experimental import pallas as pl
from jax.experimental.pallas import tpu as pltpu


def _round_up(v, m):
    return (v + m - 1) // m * m


def _fused_graphsage_kernel(x_ref, w1_ref, a_ref, b1_ref, w2_ref, b2_ref,
                            o_ref, xw1_acc, *, h_pad, c_pad, n_classes):
    k = pl.program_id(0)

    @pl.when(k == 0)
    def _():
        xw1_acc[...] = jnp.zeros_like(xw1_acc)

    # Layer-1 feature transform X @ [W_l1 | W_r1], K-tiled over the grid
    # (bf16 operands, f32 accumulation in VMEM scratch).
    xw1_acc[...] += jnp.dot(x_ref[...], w1_ref[...],
                            preferred_element_type=jnp.float32)

    @pl.when(k == pl.num_programs(0) - 1)
    def _():
        a = a_ref[...]                                  # [N, N] bf16 (resident)
        xw1 = xw1_acc[...]                              # [N, 2*H] f32

        # Layer 1: aggregate transformed neighbors + root term + bias.
        h1 = (jnp.dot(a, xw1[:, :h_pad].astype(jnp.bfloat16),
                      preferred_element_type=jnp.float32)
              + xw1[:, h_pad:] + b1_ref[...])

        # Layer 2 transform with concatenated [W_l2 | W_r2].
        xw2 = jnp.dot(h1.astype(jnp.bfloat16), w2_ref[...],
                      preferred_element_type=jnp.float32)
        h2 = (jnp.dot(a, xw2[:, :c_pad].astype(jnp.bfloat16),
                      preferred_element_type=jnp.float32)
              + xw2[:, c_pad:] + b2_ref[...])

        # relu, then numerically-stable log_softmax over the real class lanes
        # (padded lanes masked out of max / sum).
        h2 = jnp.maximum(h2, 0.0)
        col = jax.lax.broadcasted_iota(jnp.int32, h2.shape, 1)
        valid = col < n_classes
        hm = jnp.where(valid, h2, jnp.float32(-1e30))
        m = jnp.max(hm, axis=1, keepdims=True)
        e = jnp.where(valid, jnp.exp(hm - m), 0.0)
        s = jnp.sum(e, axis=1, keepdims=True)
        o_ref[...] = (h2 - m - jnp.log(s)).astype(o_ref.dtype)


def graphsage_forward(x, edge_index, params):
    n, f_in = x.shape
    h_dim = params["w_l1"].shape[1]
    c_dim = params["w_l2"].shape[1]

    n_pad = _round_up(n, 128)       # fill the MXU M dimension
    f_pad = _round_up(f_in, 128)    # 1433 -> 1536 (aligned K tiles)
    h_pad = _round_up(h_dim, 128)   # lane-dense hidden
    c_pad = _round_up(c_dim, 128)   # lane-dense output (strip later)

    # ---- plain-JAX data prep (glue) -------------------------------------
    # Dense row-normalized adjacency: A[i, j] = 1/deg(i) per edge j -> i, so
    # A @ X == PyG scatter-mean (duplicates counted; isolated nodes -> 0).
    src, dst = edge_index[0], edge_index[1]
    a = jnp.zeros((n, n), jnp.float32).at[dst, src].add(1.0)
    deg = jnp.sum(a, axis=1, keepdims=True)
    a = a / jnp.maximum(deg, 1.0)
    a = jnp.pad(a, ((0, n_pad - n), (0, n_pad - n))).astype(jnp.bfloat16)

    x_p = jnp.pad(x, ((0, n_pad - n), (0, f_pad - f_in))).astype(jnp.bfloat16)

    def pad2(w, r, c):
        return jnp.pad(w, ((0, r - w.shape[0]), (0, c - w.shape[1])))

    w1cat = jnp.concatenate(
        [pad2(params["w_l1"], f_pad, h_pad), pad2(params["w_r1"], f_pad, h_pad)],
        axis=1).astype(jnp.bfloat16)                       # [f_pad, 2*h_pad]
    w2cat = jnp.concatenate(
        [pad2(params["w_l2"], h_pad, c_pad), pad2(params["w_r2"], h_pad, c_pad)],
        axis=1).astype(jnp.bfloat16)                       # [h_pad, 2*c_pad]
    b1 = pad2(params["b_l1"], 1, h_pad).astype(jnp.float32)
    b2 = pad2(params["b_l2"], 1, c_pad).astype(jnp.float32)

    # K-tiling of the dominant X @ W1 matmul.
    tk = max(t for t in (512, 256, 128) if f_pad % t == 0)
    k_tiles = f_pad // tk

    flops = (2 * n_pad * f_pad * 2 * h_pad       # X @ [W_l1 | W_r1]
             + 2 * n_pad * n_pad * h_pad         # A @ (X W_l1)
             + 2 * n_pad * h_pad * 2 * c_pad     # h1 @ [W_l2 | W_r2]
             + 2 * n_pad * n_pad * c_pad)        # A @ (h1 W_l2)
    bytes_accessed = (x_p.size * 2 + w1cat.size * 2 + a.size * 2
                      + w2cat.size * 2 + b1.size * 4 + b2.size * 4
                      + n_pad * c_pad * 4)

    kernel = functools.partial(_fused_graphsage_kernel,
                               h_pad=h_pad, c_pad=c_pad, n_classes=c_dim)

    out = pl.pallas_call(
        kernel,
        out_shape=jax.ShapeDtypeStruct((n_pad, c_pad), jnp.float32),
        grid=(k_tiles,),
        in_specs=[
            pl.BlockSpec((n_pad, tk), lambda k: (0, k)),          # X (K-tiled)
            pl.BlockSpec((tk, 2 * h_pad), lambda k: (k, 0)),      # W1cat (K-tiled)
            pl.BlockSpec((n_pad, n_pad), lambda k: (0, 0)),       # A (resident)
            pl.BlockSpec((1, h_pad), lambda k: (0, 0)),           # b1
            pl.BlockSpec((h_pad, 2 * c_pad), lambda k: (0, 0)),   # W2cat
            pl.BlockSpec((1, c_pad), lambda k: (0, 0)),           # b2
        ],
        out_specs=pl.BlockSpec((n_pad, c_pad), lambda k: (0, 0)),
        scratch_shapes=[pltpu.VMEM((n_pad, 2 * h_pad), jnp.float32)],
        compiler_params=pltpu.CompilerParams(
            dimension_semantics=("arbitrary",)),
        cost_estimate=pl.CostEstimate(
            flops=flops, transcendentals=n_pad * c_pad,
            bytes_accessed=bytes_accessed),
    )(x_p, w1cat, a, b1, w2cat, b2)

    # TODO(synk): qunt()/dequnt() in the reference only feed a debug print
    #             (host loops + Python random) and do not affect the result.
    # TODO(synk): F.dropout(p=0.5) is identity at inference time.
    # TODO(synk): for realistic graphs (Cora N=2708+) the dense A should become
    #             a scalar-prefetch CSR gather SpMM and the node-row axis should
    #             be tiled across the grid (megacore / v7x VMEM).
    return out[:n, :c_dim]


def init_params(key):
    k1, k2, k3, k4 = jax.random.split(key, 4)

    def glorot(k, fan_in, fan_out):
        lim = (6.0 / (fan_in + fan_out)) ** 0.5
        return jax.random.uniform(k, (fan_in, fan_out), jnp.float32, -lim, lim)

    return {
        "w_l1": glorot(k1, 1433, 64),
        "w_r1": glorot(k2, 1433, 64),
        "b_l1": jnp.zeros((1, 64), jnp.float32),
        "w_l2": glorot(k3, 64, 32),
        "w_r2": glorot(k4, 64, 32),
        "b_l2": jnp.zeros((1, 32), jnp.float32),
    }


if __name__ == "__main__":
    key = jax.random.PRNGKey(0)
    kx, ke, kp = jax.random.split(key, 3)

    # Small synthetic graph consistent with the module: Cora-like 1433-dim
    # features, 2-layer SAGE 1433 -> 64 -> 32.
    N, E, F_IN = 64, 256, 1433
    x = jax.random.normal(kx, (N, F_IN), jnp.float32)
    edge_index = jax.random.randint(ke, (2, E), 0, N, dtype=jnp.int32)

    params = init_params(kp)

    out = jax.jit(graphsage_forward)(x, edge_index, params)
    out = jax.block_until_ready(out)

    assert out.shape == (N, 32)
    assert bool(jnp.all(jnp.isfinite(out)))
    # log_softmax rows must sum to ~1 in probability space
    assert bool(jnp.allclose(jnp.sum(jnp.exp(out), axis=1), 1.0, atol=1e-4))

    print("KERNEL_OK")
</pallas_src>

<mosaic_0001>
module attributes {stable_mosaic.version = 11 : i64} {
  func.func private @main(%arg0: i32) attributes {dimension_semantics = [#tpu.dimension_semantics<core_parallel>], iteration_bounds = array<i64: 2>, tpu.core_type = #tpu.core_type<sc_scalar_subcore>, window_params = []} {
    return
  }
}

module attributes {stable_mosaic.version = 11 : i64} {
  func.func private @main(%arg0: i32) attributes {dimension_semantics = [#tpu.dimension_semantics<core_parallel>], iteration_bounds = array<i64: 2>, tpu.core_type = #tpu.core_type<sc_scalar_subcore>, window_params = []} {
    return
  }
}

module attributes {stable_mosaic.version = 11 : i64} {
  func.func @_fused_graphsage_kernel(%arg0: i32, %arg1: memref<128x512xbf16, #tpu.memory_space<vmem>>, %arg2: memref<512x256xbf16, #tpu.memory_space<vmem>>, %arg3: memref<128x128xbf16, #tpu.memory_space<vmem>>, %arg4: memref<1x128xf32, #tpu.memory_space<vmem>>, %arg5: memref<128x256xbf16, #tpu.memory_space<vmem>>, %arg6: memref<1x128xf32, #tpu.memory_space<vmem>>, %arg7: memref<128x128xf32, #tpu.memory_space<vmem>>, %arg8: memref<128x256xf32, #tpu.memory_space<vmem>>) attributes {dimension_semantics = [#tpu.dimension_semantics<arbitrary>], iteration_bounds = array<i64: 3>, scalar_prefetch = 0 : i64, scratch_operands = 1 : i64, tpu.core_type = #tpu.core_type<tc>, window_params = [{transform_indices = @transform_0, window_bounds = array<i64: 128, 512>}, {transform_indices = @transform_1, window_bounds = array<i64: 512, 256>}, {pipeline_mode = #tpu.pipeline_mode<synchronous>, transform_indices = @transform_2, window_bounds = array<i64: 128, 128>}, {pipeline_mode = #tpu.pipeline_mode<synchronous>, transform_indices = @transform_3, window_bounds = array<i64: 1, 128>}, {pipeline_mode = #tpu.pipeline_mode<synchronous>, transform_indices = @transform_4, window_bounds = array<i64: 128, 256>}, {pipeline_mode = #tpu.pipeline_mode<synchronous>, transform_indices = @transform_5, window_bounds = array<i64: 1, 128>}, {pipeline_mode = #tpu.pipeline_mode<synchronous>, transform_indices = @transform_6, window_bounds = array<i64: 128, 128>}]} {
    %c0_i32 = arith.constant 0 : i32
    %0 = arith.cmpi eq, %arg0, %c0_i32 : i32
    %1 = arith.extui %0 : i1 to i32
    %c0_i32_0 = arith.constant 0 : i32
    %2 = arith.cmpi ne, %1, %c0_i32_0 : i32
    scf.if %2 {
      %cst_9 = arith.constant 0.000000e+00 : f32
      %12 = vector.broadcast %cst_9 : f32 to vector<128x256xf32>
      %c0_10 = arith.constant 0 : index
      %c0_11 = arith.constant 0 : index
      %13 = vector.load %arg8[%c0_10, %c0_11] : memref<128x256xf32, #tpu.memory_space<vmem>>, vector<128x256xf32>
      tpu.vector_store %arg8[%c0_10, %c0_11], %12 {strides = array<i32>} : memref<128x256xf32, #tpu.memory_space<vmem>>, vector<128x256xf32>,
    } else {
    }
    %c0 = arith.constant 0 : index
    %c0_1 = arith.constant 0 : index
    %3 = vector.load %arg8[%c0, %c0_1] : memref<128x256xf32, #tpu.memory_space<vmem>>, vector<128x256xf32>
    %c0_2 = arith.constant 0 : index
    %c0_3 = arith.constant 0 : index
    %4 = vector.load %arg1[%c0_2, %c0_3] : memref<128x512xbf16, #tpu.memory_space<vmem>>, vector<128x512xbf16>
    %c0_4 = arith.constant 0 : index
    %c0_5 = arith.constant 0 : index
    %5 = vector.load %arg2[%c0_4, %c0_5] : memref<512x256xbf16, #tpu.memory_space<vmem>>, vector<512x256xbf16>
    %cst = arith.constant dense<0.000000e+00> : vector<128x256xf32>
    %6 = tpu.matmul %4, %5, %cst {dimension_numbers = #tpu.dot_dimension_numbers<[1], [0], [0], [1], [0, 0, 1, 1], [], []>} : vector<128x512xbf16>, vector<512x256xbf16>, vector<128x256xf32> -> vector<128x256xf32>
    %7 = arith.addf %3, %6 : vector<128x256xf32>
    %c0_6 = arith.constant 0 : index
    %c0_7 = arith.constant 0 : index
    %8 = vector.load %arg8[%c0_6, %c0_7] : memref<128x256xf32, #tpu.memory_space<vmem>>, vector<128x256xf32>
    tpu.vector_store %arg8[%c0_6, %c0_7], %7 {strides = array<i32>} : memref<128x256xf32, #tpu.memory_space<vmem>>, vector<128x256xf32>,
    %c2_i32 = arith.constant 2 : i32
    %9 = arith.cmpi eq, %arg0, %c2_i32 : i32
    %10 = arith.extui %9 : i1 to i32
    %c0_i32_8 = arith.constant 0 : i32
    %11 = arith.cmpi ne, %10, %c0_i32_8 : i32
    scf.if %11 {
      %c0_9 = arith.constant 0 : index
      %c0_10 = arith.constant 0 : index
      %12 = vector.load %arg3[%c0_9, %c0_10] : memref<128x128xbf16, #tpu.memory_space<vmem>>, vector<128x128xbf16>
      %c0_11 = arith.constant 0 : index
      %c0_12 = arith.constant 0 : index
      %13 = vector.load %arg8[%c0_11, %c0_12] : memref<128x256xf32, #tpu.memory_space<vmem>>, vector<128x256xf32>
      %14 = vector.extract_strided_slice %13 {offsets = [0, 0], sizes = [128, 128], strides = [1, 1]} : vector<128x256xf32> to vector<128x128xf32>
      %15 = arith.truncf %14 : vector<128x128xf32> to vector<128x128xbf16>
      %cst_13 = arith.constant dense<0.000000e+00> : vector<128x128xf32>
      %16 = tpu.matmul %12, %15, %cst_13 {dimension_numbers = #tpu.dot_dimension_numbers<[1], [0], [0], [1], [0, 0, 1, 1], [], []>} : vector<128x128xbf16>, vector<128x128xbf16>, vector<128x128xf32> -> vector<128x128xf32>
      %17 = vector.extract_strided_slice %13 {offsets = [0, 128], sizes = [128, 128], strides = [1, 1]} : vector<128x256xf32> to vector<128x128xf32>
      %18 = arith.addf %16, %17 : vector<128x128xf32>
      %c0_14 = arith.constant 0 : index
      %c0_15 = arith.constant 0 : index
      %19 = vector.load %arg4[%c0_14, %c0_15] : memref<1x128xf32, #tpu.memory_space<vmem>>, vector<1x128xf32>
      %20 = vector.broadcast %19 : vector<1x128xf32> to vector<128x128xf32>
      %21 = arith.addf %18, %20 : vector<128x128xf32>
      %22 = arith.truncf %21 : vector<128x128xf32> to vector<128x128xbf16>
      %c0_16 = arith.constant 0 : index
      %c0_17 = arith.constant 0 : index
      %23 = vector.load %arg5[%c0_16, %c0_17] : memref<128x256xbf16, #tpu.memory_space<vmem>>, vector<128x256xbf16>
      %cst_18 = arith.constant dense<0.000000e+00> : vector<128x256xf32>
      %24 = tpu.matmul %22, %23, %cst_18 {dimension_numbers = #tpu.dot_dimension_numbers<[1], [0], [0], [1], [0, 0, 1, 1], [], []>} : vector<128x128xbf16>, vector<128x256xbf16>, vector<128x256xf32> -> vector<128x256xf32>
      %25 = vector.extract_strided_slice %24 {offsets = [0, 0], sizes = [128, 128], strides = [1, 1]} : vector<128x256xf32> to vector<128x128xf32>
      %26 = arith.truncf %25 : vector<128x128xf32> to vector<128x128xbf16>
      %cst_19 = arith.constant dense<0.000000e+00> : vector<128x128xf32>
      %27 = tpu.matmul %12, %26, %cst_19 {dimension_numbers = #tpu.dot_dimension_numbers<[1], [0], [0], [1], [0, 0, 1, 1], [], []>} : vector<128x128xbf16>, vector<128x128xbf16>, vector<128x128xf32> -> vector<128x128xf32>
      %28 = vector.extract_strided_slice %24 {offsets = [0, 128], sizes = [128, 128], strides = [1, 1]} : vector<128x256xf32> to vector<128x128xf32>
      %29 = arith.addf %27, %28 : vector<128x128xf32>
      %c0_20 = arith.constant 0 : index
      %c0_21 = arith.constant 0 : index
      %30 = vector.load %arg6[%c0_20, %c0_21] : memref<1x128xf32, #tpu.memory_space<vmem>>, vector<1x128xf32>
      %31 = vector.broadcast %30 : vector<1x128xf32> to vector<128x128xf32>
      %32 = arith.addf %29, %31 : vector<128x128xf32>
      %cst_22 = arith.constant 0.000000e+00 : f32
      %33 = vector.broadcast %cst_22 : f32 to vector<128x128xf32>
      %34 = arith.maximumf %32, %33 : vector<128x128xf32>
      %35 = tpu.iota {dimensions = array<i32: 1>} : vector<128x128xi32>
      %c32_i32 = arith.constant 32 : i32
      %36 = vector.broadcast %c32_i32 : i32 to vector<128x128xi32>
      %37 = arith.cmpi slt, %35, %36 : vector<128x128xi32>
      %cst_23 = arith.constant -1.000000e+30 : f32
      %38 = vector.broadcast %cst_23 : f32 to vector<128x128xf32>
      %39 = arith.select %37, %34, %38 : vector<128x128xi1>, vector<128x128xf32>
      %cst_24 = arith.constant dense<0xFF800000> : vector<128xf32>
      %40 = vector.multi_reduction <maximumf>, %39, %cst_24 [1] : vector<128x128xf32> to vector<128xf32>
      %41 = vector.shape_cast %40 : vector<128xf32> to vector<128x1xf32>
      %42 = vector.broadcast %41 : vector<128x1xf32> to vector<128x128xf32>
      %43 = arith.subf %39, %42 : vector<128x128xf32>
      %44 = math.exp %43 : vector<128x128xf32>
      %cst_25 = arith.constant 0.000000e+00 : f32
      %45 = vector.broadcast %cst_25 : f32 to vector<128x128xf32>
      %46 = arith.select %37, %44, %45 : vector<128x128xi1>, vector<128x128xf32>
      %cst_26 = arith.constant dense<0.000000e+00> : vector<128xf32>
      %47 = vector.multi_reduction <add>, %46, %cst_26 [1] : vector<128x128xf32> to vector<128xf32>
      %48 = vector.shape_cast %47 : vector<128xf32> to vector<128x1xf32>
      %49 = vector.broadcast %41 : vector<128x1xf32> to vector<128x128xf32>
      %50 = arith.subf %34, %49 : vector<128x128xf32>
      %51 = math.log %48 : vector<128x1xf32>
      %52 = vector.broadcast %51 : vector<128x1xf32> to vector<128x128xf32>
      %53 = arith.subf %50, %52 : vector<128x128xf32>
      %c0_27 = arith.constant 0 : index
      %c0_28 = arith.constant 0 : index
      %54 = vector.load %arg7[%c0_27, %c0_28] : memref<128x128xf32, #tpu.memory_space<vmem>>, vector<128x128xf32>
      tpu.vector_store %arg7[%c0_27, %c0_28], %53 {strides = array<i32>} : memref<128x128xf32, #tpu.memory_space<vmem>>, vector<128x128xf32>,
    } else {
    }
    return
  }
  func.func @transform_0(%arg0: i32) -> (i32, i32) {
    %c0_i32 = arith.constant 0 : i32
    %c0_i32_0 = arith.constant 0 : i32
    return %c0_i32, %arg0 : i32, i32
  }
  func.func @transform_1(%arg0: i32) -> (i32, i32) {
    %c0_i32 = arith.constant 0 : i32
    %c0_i32_0 = arith.constant 0 : i32
    return %arg0, %c0_i32 : i32, i32
  }
  func.func @transform_2(%arg0: i32) -> (i32, i32) {
    %c0_i32 = arith.constant 0 : i32
    %c0_i32_0 = arith.constant 0 : i32
    %c0_i32_1 = arith.constant 0 : i32
    return %c0_i32, %c0_i32_0 : i32, i32
  }
  func.func @transform_3(%arg0: i32) -> (i32, i32) {
    %c0_i32 = arith.constant 0 : i32
    %c0_i32_0 = arith.constant 0 : i32
    %c0_i32_1 = arith.constant 0 : i32
    return %c0_i32, %c0_i32_0 : i32, i32
  }
  func.func @transform_4(%arg0: i32) -> (i32, i32) {
    %c0_i32 = arith.constant 0 : i32
    %c0_i32_0 = arith.constant 0 : i32
    %c0_i32_1 = arith.constant 0 : i32
    return %c0_i32, %c0_i32_0 : i32, i32
  }
  func.func @transform_5(%arg0: i32) -> (i32, i32) {
    %c0_i32 = arith.constant 0 : i32
    %c0_i32_0 = arith.constant 0 : i32
    %c0_i32_1 = arith.constant 0 : i32
    return %c0_i32, %c0_i32_0 : i32, i32
  }
  func.func @transform_6(%arg0: i32) -> (i32, i32) {
    %c0_i32 = arith.constant 0 : i32
    %c0_i32_0 = arith.constant 0 : i32
    %c0_i32_1 = arith.constant 0 : i32
    return %c0_i32, %c0_i32_0 : i32, i32
  }
}

</mosaic_0001>

<bundles_post_ra>
// kernel: graphsage_forward.1
= control target key start
LH: loop header
LB: loop body
LE: loop exit
PB: predicated region body
PF: predicated region fallthrough
CT: control target
= control target key end

     0   :  { %s2736_s21 = smov 0   ;;  %s2738_s22 = smov 0   ;;  %s3510_s0 = inlined_call_operand.vmem [shape: bf16[128,1536], index: 0, kind: input, shape index: {}]   ;;  %s3511_s1 = inlined_call_operand.vmem [shape: bf16[1536,256], index: 1, kind: input, shape index: {}]   ;;  %s3512_s2 = inlined_call_operand.vmem [shape: bf16[128,128], index: 2, kind: input, shape index: {}]   ;;  %s3513_s3 = inlined_call_operand.vmem [shape: f32[1,128], index: 3, kind: input, shape index: {}]   ;;  %s3514_s4 = inlined_call_operand.vmem [shape: bf16[128,256], index: 4, kind: input, shape index: {}]   ;;  %s3515_s5 = inlined_call_operand.vmem [shape: f32[1,128], index: 5, kind: input, shape index: {}]   ;;  %s3516_s6 = inlined_call_operand.vmem [shape: f32[128,128], index: 6, kind: output, shape index: {}]  }
   0x1   :  { %s2740_s23 = smov 0  }
   0x2 LB: > { %s2752_s24 = sadd.s32 4294967295, %s2697_s23   ;;  %s2755_s25 = sadd.s32 1, %s2697_s23   ;;  %s2697_s23 = sphi %s2740_s23, %s3519_s23   ;;  %s2693_s22 = sphi %s2738_s22, %s3518_s22   ;;  %s2689_s21 = sphi %s2736_s21, %s3517_s21  }
   0x3   : > { %s20_s26 = ssub.s32 %s2697_s23, %s2755_s25  ;;  %s23_s27 = sadd.s32 1, %s2693_s22 }
   0x4   : > { %p21_p0 = scmp.eq.s32.totalorder %s20_s26, 0  ;;  %p30_p1 = scmp.ne.s32.totalorder %s2693_s22, %s2689_s21 }
   0x5   : > { %p31_p2 = scmp.eq.s32.totalorder %s2697_s23, 0  ;;  %p2144_p4 = scmp.ge.s32.totalorder %s2697_s23, 3 }
   0x6   : > { %s2764_s28 = scalar_select %p21_p0, %s2693_s22, %s23_s27  }
   0x7   : > { %p32_p3 = por %p31_p2, %p30_p1  ;;  %199 = sbr.rel (%p2144_p4) target bundleno = 34 (0x22), region = 32 }
   0xe   : > { %202 = sbr.rel (!%p32_p3) target bundleno = 34 (0x22), region = 36  ;;  %s204_s29 = sand.u32 (%p32_p3), 1, %s2693_s22  }
   0xf   : > { %s2279_s30 = sshll.u32 (%p32_p3), %s2697_s23, 4  ;;  %s2145_s7 = sshll.u32 (%p32_p3), %s204_s29, 8 }
  0x10   : > { %s2772_s10 = scalar_lea.vmem (%p32_p3), %s3510_s0, %s2279_s30  ;;  %s2777_s11 = scalar_lea.vmem (%p32_p3), [#allocation3], %s2145_s7 }
  0x11   : > { %v222_v0 = vld [vmem:[%s2772_s10] sm:$0xff] (%p32_p3)  ;;  %v224_v1 = vld [vmem:[%s2772_s10 + $0x8] sm:$0xff] (%p32_p3)  ;;  %v226_v2 = vld [vmem:[%s2772_s10 + $0x30] sm:$0xff] (%p32_p3) }
  0x12   : > { %223 = vst [vmem:[%s2777_s11] sm:$0xff] (%p32_p3), %v222_v0  ;;  %225 = vst [vmem:[%s2777_s11 + $0x8] sm:$0xff] (%p32_p3), %v224_v1  ;;  %v228_v3 = vld [vmem:[%s2772_s10 + $0x38] sm:$0xff] (%p32_p3)  ;;  %v230_v4 = vld [vmem:[%s2772_s10 + $0x60] sm:$0xff] (%p32_p3) }
  0x13   : > { %227 = vst [vmem:[%s2777_s11 + $0x10] sm:$0xff] (%p32_p3), %v226_v2  ;;  %v232_v5 = vld [vmem:[%s2772_s10 + $0x68] sm:$0xff] (%p32_p3)  ;;  %229 = vst [vmem:[%s2777_s11 + $0x18] sm:$0xff] (%p32_p3), %v228_v3  ;;  %v234_v6 = vld [vmem:[%s2772_s10 + $0x90] sm:$0xff] (%p32_p3) }
  0x14   : > { %231 = vst [vmem:[%s2777_s11 + $0x20] sm:$0xff] (%p32_p3), %v230_v4  ;;  %233 = vst [vmem:[%s2777_s11 + $0x28] sm:$0xff] (%p32_p3), %v232_v5  ;;  %v236_v7 = vld [vmem:[%s2772_s10 + $0x98] sm:$0xff] (%p32_p3)  ;;  %v238_v8 = vld [vmem:[%s2772_s10 + $0xc0] sm:$0xff] (%p32_p3) }
  0x15   : > { %235 = vst [vmem:[%s2777_s11 + $0x30] sm:$0xff] %v234_v6  ;;  %237 = vst [vmem:[%s2777_s11 + $0x38] sm:$0xff] %v236_v7  ;;  %v240_v9 = vld [vmem:[%s2772_s10 + $0xc8] sm:$0xff]  ;;  %v242_v10 = vld [vmem:[%s2772_s10 + $0xf0] sm:$0xff] }
  0x16   : > { %239 = vst [vmem:[%s2777_s11 + $0x40] sm:$0xff] %v238_v8  ;;  %v244_v11 = vld [vmem:[%s2772_s10 + $0xf8] sm:$0xff]  ;;  %241 = vst [vmem:[%s2777_s11 + $0x48] sm:$0xff] %v240_v9  ;;  %v246_v12 = vld [vmem:[%s2772_s10 + $0x120] sm:$0xff] }
  0x17   : > { %243 = vst [vmem:[%s2777_s11 + $0x50] sm:$0xff] %v242_v10  ;;  %245 = vst [vmem:[%s2777_s11 + $0x58] sm:$0xff] %v244_v11  ;;  %v248_v13 = vld [vmem:[%s2772_s10 + $0x128] sm:$0xff]  ;;  %v250_v14 = vld [vmem:[%s2772_s10 + $0x150] sm:$0xff] }
  0x18   : > { %247 = vst [vmem:[%s2777_s11 + $0x60] sm:$0xff] %v246_v12  ;;  %249 = vst [vmem:[%s2777_s11 + $0x68] sm:$0xff] %v248_v13  ;;  %v252_v15 = vld [vmem:[%s2772_s10 + $0x158] sm:$0xff]  ;;  %v254_v16 = vld [vmem:[%s2772_s10 + $0x180] sm:$0xff] }
  0x19   : > { %251 = vst [vmem:[%s2777_s11 + $0x70] sm:$0xff] %v250_v14  ;;  %v256_v17 = vld [vmem:[%s2772_s10 + $0x188] sm:$0xff]  ;;  %253 = vst [vmem:[%s2777_s11 + $0x78] sm:$0xff] %v252_v15  ;;  %v258_v18 = vld [vmem:[%s2772_s10 + $0x1b0] sm:$0xff] }
  0x1a   : > { %255 = vst [vmem:[%s2777_s11 + $0x80] sm:$0xff] %v254_v16  ;;  %257 = vst [vmem:[%s2777_s11 + $0x88] sm:$0xff] %v256_v17  ;;  %v260_v19 = vld [vmem:[%s2772_s10 + $0x1b8] sm:$0xff]  ;;  %v262_v20 = vld [vmem:[%s2772_s10 + $0x1e0] sm:$0xff] }
  0x1b   : > { %259 = vst [vmem:[%s2777_s11 + $0x90] sm:$0xff] %v258_v18  ;;  %261 = vst [vmem:[%s2777_s11 + $0x98] sm:$0xff] %v260_v19  ;;  %v264_v21 = vld [vmem:[%s2772_s10 + $0x1e8] sm:$0xff]  ;;  %v266_v22 = vld [vmem:[%s2772_s10 + $0x210] sm:$0xff] }
  0x1c   : > { %263 = vst [vmem:[%s2777_s11 + $0xa0] sm:$0xff] %v262_v20  ;;  %v268_v23 = vld [vmem:[%s2772_s10 + $0x218] sm:$0xff]  ;;  %265 = vst [vmem:[%s2777_s11 + $0xa8] sm:$0xff] %v264_v21  ;;  %v270_v24 = vld [vmem:[%s2772_s10 + $0x240] sm:$0xff] }
  0x1d   : > { %267 = vst [vmem:[%s2777_s11 + $0xb0] sm:$0xff] %v266_v22  ;;  %269 = vst [vmem:[%s2777_s11 + $0xb8] sm:$0xff] %v268_v23  ;;  %v272_v25 = vld [vmem:[%s2772_s10 + $0x248] sm:$0xff]  ;;  %v274_v26 = vld [vmem:[%s2772_s10 + $0x270] sm:$0xff] }
  0x1e   : > { %271 = vst [vmem:[%s2777_s11 + $0xc0] sm:$0xff] %v270_v24  ;;  %273 = vst [vmem:[%s2777_s11 + $0xc8] sm:$0xff] %v272_v25  ;;  %v276_v27 = vld [vmem:[%s2772_s10 + $0x278] sm:$0xff]  ;;  %v278_v28 = vld [vmem:[%s2772_s10 + $0x2a0] sm:$0xff] }
  0x1f   : > { %275 = vst [vmem:[%s2777_s11 + $0xd0] sm:$0xff] %v274_v26  ;;  %v280_v29 = vld [vmem:[%s2772_s10 + $0x2a8] sm:$0xff]  ;;  %277 = vst [vmem:[%s2777_s11 + $0xd8] sm:$0xff] %v276_v27  ;;  %v282_v30 = vld [vmem:[%s2772_s10 + $0x2d0] sm:$0xff] }
  0x20   : > { %279 = vst [vmem:[%s2777_s11 + $0xe0] sm:$0xff] %v278_v28  ;;  %281 = vst [vmem:[%s2777_s11 + $0xe8] sm:$0xff] %v280_v29  ;;  %v284_v31 = vld [vmem:[%s2772_s10 + $0x2d8] sm:$0xff] }
  0x21   : > { %283 = vst [vmem:[%s2777_s11 + $0xf0] sm:$0xff] %v282_v30  ;;  %285 = vst [vmem:[%s2777_s11 + $0xf8] sm:$0xff] %v284_v31 }
  0x22 PF: > { %p2148_p5 = scmp.ge.s32.totalorder %s2697_s23, 1  ;;  %p300_p6 = scmp.lt.s32.totalorder %s2697_s23, 4 }
  0x24   : > { %p301_p7 = pnand %p2148_p5, %p300_p6 }
  0x25   : > { %s307_s12 = sand.u32 (!%p301_p7), 1, %s2689_s21   ;;  %s2150_s13 = sshll.u32 (!%p301_p7), %s2752_s24, 6 }
  0x26   : > { %304 = sbr.rel (%p301_p7) target bundleno = 1481 (0x5c9), region = 63  ;;  %s2149_s14 = sshll.u32 (!%p301_p7), %s307_s12, 8 }
  0x27   : > { %p339_p8 = scmp.lt.s32.totalorder (!%p301_p7), %s2150_s13, 191  ;;  %s2849_s19 = scalar_lea.vmem (!%p301_p7), [#allocation3], %s2149_s14 }
  0x28   : > { %p2153_p9 = scmp.ne.s32.totalorder (!%p301_p7), %s2752_s24, 0 }
  0x2d   : > { %s3521_s13 = smov (!%p339_p8, %s2150_s13), 191  ;;  %349 = sbr.rel (%p2153_p9) target bundleno = 63 (0x3f), region = 71 }
  0x2e   : > { %s2280_s15 = sshll.u32 %s3521_s13, 3  ;;  %v2699_v32 = vmov (!%p2153_p9), 0.0  }
  0x2f   : > { %s2847_s18 = scalar_lea.vmem %s3511_s1, %s2280_s15  ;;  %350 = vst [vmem:[#allocation2] sm:$0xff] (!%p2153_p9), %v2699_v32  ;;  %351 = vst [vmem:[#allocation2 + $0x8] sm:$0xff] (!%p2153_p9), %v2699_v32 }
  0x30   : > { %352 = vst [vmem:[#allocation2 + $0x10] sm:$0xff] (!%p2153_p9), %v2699_v32  ;;  %353 = vst [vmem:[#allocation2 + $0x18] sm:$0xff] (!%p2153_p9), %v2699_v32 }
  0x31   : > { %354 = vst [vmem:[#allocation2 + $0x20] sm:$0xff] (!%p2153_p9), %v2699_v32  ;;  %355 = vst [vmem:[#allocation2 + $0x28] sm:$0xff] (!%p2153_p9), %v2699_v32 }
  0x32   : > { %356 = vst [vmem:[#allocation2 + $0x30] sm:$0xff] (!%p2153_p9), %v2699_v32  ;;  %357 = vst [vmem:[#allocation2 + $0x38] sm:$0xff] (!%p2153_p9), %v2699_v32 }
  0x33   : > { %358 = vst [vmem:[#allocation2 + $0x40] sm:$0xff] (!%p2153_p9), %v2699_v32  ;;  %359 = vst [vmem:[#allocation2 + $0x48] sm:$0xff] (!%p2153_p9), %v2699_v32 }
  0x34   : > { %360 = vst [vmem:[#allocation2 + $0x50] sm:$0xff] %v2699_v32  ;;  %361 = vst [vmem:[#allocation2 + $0x58] sm:$0xff] %v2699_v32 }
  0x35   : > { %362 = vst [vmem:[#allocation2 + $0x60] sm:$0xff] %v2699_v32  ;;  %363 = vst [vmem:[#allocation2 + $0x68] sm:$0xff] %v2699_v32 }
  0x36   : > { %364 = vst [vmem:[#allocation2 + $0x70] sm:$0xff] %v2699_v32  ;;  %365 = vst [vmem:[#allocation2 + $0x78] sm:$0xff] %v2699_v32 }
  0x37   : > { %366 = vst [vmem:[#allocation2 + $0x80] sm:$0xff] %v2699_v32  ;;  %367 = vst [vmem:[#allocation2 + $0x88] sm:$0xff] %v2699_v32 }
  0x38   : > { %368 = vst [vmem:[#allocation2 + $0x90] sm:$0xff] %v2699_v32  ;;  %369 = vst [vmem:[#allocation2 + $0x98] sm:$0xff] %v2699_v32 }
  0x39   : > { %370 = vst [vmem:[#allocation2 + $0xa0] sm:$0xff] %v2699_v32  ;;  %371 = vst [vmem:[#allocation2 + $0xa8] sm:$0xff] %v2699_v32 }
  0x3a   : > { %372 = vst [vmem:[#allocation2 + $0xb0] sm:$0xff] %v2699_v32  ;;  %373 = vst [vmem:[#allocation2 + $0xb8] sm:$0xff] %v2699_v32 }
  0x3b   : > { %374 = vst [vmem:[#allocation2 + $0xc0] sm:$0xff] %v2699_v32  ;;  %375 = vst [vmem:[#allocation2 + $0xc8] sm:$0xff] %v2699_v32 }
  0x3c   : > { %376 = vst [vmem:[#allocation2 + $0xd0] sm:$0xff] %v2699_v32  ;;  %377 = vst [vmem:[#allocation2 + $0xd8] sm:$0xff] %v2699_v32 }
  0x3d   : > { %378 = vst [vmem:[#allocation2 + $0xe0] sm:$0xff] %v2699_v32  ;;  %379 = vst [vmem:[#allocation2 + $0xe8] sm:$0xff] %v2699_v32 }
  0x3e   : > { %380 = vst [vmem:[#allocation2 + $0xf0] sm:$0xff] %v2699_v32  ;;  %381 = vst [vmem:[#allocation2 + $0xf8] sm:$0xff] %v2699_v32 }
  0x3f PF: > { %v2435_v33 = vld [vmem:[%s2847_s18 + $0x4] ss:$8 sps:$4 sm:$0xff]   ;;  %v2439_v35 = vld [vmem:[%s2847_s18] ss:$8 sps:$4 sm:$0xff]   ;;  %v2441_v37 = vld [vmem:[%s2847_s18 + $0x14] ss:$8 sps:$4 sm:$0xff]  }
  0x40   : > { %v2437_v34 = vld [vmem:[%s2847_s18 + $0x104] ss:$8 sps:$4 sm:$0xff]   ;;  %990 = vmatprep.subr.bf16.mxu1 %v2435_v33  ;;  %v2440_v36 = vld [vmem:[%s2847_s18 + $0x100] ss:$8 sps:$4 sm:$0xff]   ;;  %v2443_v38 = vld [vmem:[%s2847_s18 + $0x114] ss:$8 sps:$4 sm:$0xff]  }
  0x41   : > { %1103 = vmatprep.subr.bf16.mxu0 %v2437_v34  ;;  %991 = vmatpush1.bf16.msra.mxu1 %v2439_v35  ;;  %v2445_v39 = vld [vmem:[%s2847_s18 + $0x10] ss:$8 sps:$4 sm:$0xff]   ;;  %v2447_v41 = vld [vmem:[%s2847_s18 + $0x24] ss:$8 sps:$4 sm:$0xff]   ;;  %v2451_v43 = vld [vmem:[%s2847_s18 + $0x20] ss:$8 sps:$4 sm:$0xff]  }
  0x42   : > { %1104 = vmatpush1.bf16.msra.mxu0 %v2440_v36  ;;  %992 = vmatprep.subr.bf16.mxu1 %v2441_v37  ;;  %v2446_v40 = vld [vmem:[%s2847_s18 + $0x110] ss:$8 sps:$4 sm:$0xff]   ;;  %v2449_v42 = vld [vmem:[%s2847_s18 + $0x124] ss:$8 sps:$4 sm:$0xff]   ;;  %v2452_v44 = vld [vmem:[%s2847_s18 + $0x120] ss:$8 sps:$4 sm:$0xff]  }
  0x43   : > { %1105 = vmatprep.subr.bf16.mxu0 %v2443_v38  ;;  %v2453_v45 = vld [vmem:[%s2847_s18 + $0x34] ss:$8 sps:$4 sm:$0xff]   ;;  %v2457_v47 = vld [vmem:[%s2847_s18 + $0x30] ss:$8 sps:$4 sm:$0xff]   ;;  %v2459_v49 = vld [vmem:[%s2847_s18 + $0x44] ss:$8 sps:$4 sm:$0xff]  }
  0x44   : > { %v2455_v46 = vld [vmem:[%s2847_s18 + $0x134] ss:$8 sps:$4 sm:$0xff]   ;;  %v2458_v48 = vld [vmem:[%s2847_s18 + $0x130] ss:$8 sps:$4 sm:$0xff]   ;;  %v2461_v50 = vld [vmem:[%s2847_s18 + $0x144] ss:$8 sps:$4 sm:$0xff]  }
  0x45   : > { %993 = vmatpush1.bf16.msra.mxu1 %v2445_v39  ;;  %v2463_v51 = vld [vmem:[%s2847_s18 + $0x40] ss:$8 sps:$4 sm:$0xff]   ;;  %v2465_v53 = vld [vmem:[%s2847_s18 + $0x54] ss:$8 sps:$4 sm:$0xff]   ;;  %v2469_v55 = vld [vmem:[%s2847_s18 + $0x50] ss:$8 sps:$4 sm:$0xff]  }
  0x46   : > { %1106 = vmatpush1.bf16.msra.mxu0 %v2446_v40  ;;  %994 = vmatprep.subr.bf16.mxu1 %v2447_v41  ;;  %v2464_v52 = vld [vmem:[%s2847_s18 + $0x140] ss:$8 sps:$4 sm:$0xff]   ;;  %v2467_v54 = vld [vmem:[%s2847_s18 + $0x154] ss:$8 sps:$4 sm:$0xff]   ;;  %v2470_v56 = vld [vmem:[%s2847_s18 + $0x150] ss:$8 sps:$4 sm:$0xff]  }
  0x47   : > { %1107 = vmatprep.subr.bf16.mxu0 %v2449_v42  ;;  %v2471_v57 = vld [vmem:[%s2847_s18 + $0x64] ss:$8 sps:$4 sm:$0xff]   ;;  %v2475_v59 = vld [vmem:[%s2847_s18 + $0x60] ss:$8 sps:$4 sm:$0xff]   ;;  %v2477_v61 = vld [vmem:[%s2847_s18 + $0x74] ss:$8 sps:$4 sm:$0xff]  }
  0x48   : > { %v2473_v58 = vld [vmem:[%s2847_s18 + $0x164] ss:$8 sps:$4 sm:$0xff]   ;;  %v2476_v60 = vld [vmem:[%s2847_s18 + $0x160] ss:$8 sps:$4 sm:$0xff]   ;;  %v2479_v62 = vld [vmem:[%s2847_s18 + $0x174] ss:$8 sps:$4 sm:$0xff]  }
  0x49   : > { %995 = vmatpush1.bf16.msra.mxu1 %v2451_v43  ;;  %v2481_v63 = vld [vmem:[%s2847_s18 + $0x70] ss:$8 sps:$4 sm:$0xff]   ;;  %v2483_v1 = vld [vmem:[%s2847_s18 + $0x84] ss:$8 sps:$4 sm:$0xff]   ;;  %v2487_v3 = vld [vmem:[%s2847_s18 + $0x80] ss:$8 sps:$4 sm:$0xff]  }
  0x4a   : > { %1108 = vmatpush1.bf16.msra.mxu0 %v2452_v44  ;;  %996 = vmatprep.subr.bf16.mxu1 %v2453_v45  ;;  %v2482_v0 = vld [vmem:[%s2847_s18 + $0x170] ss:$8 sps:$4 sm:$0xff]   ;;  %v2485_v2 = vld [vmem:[%s2847_s18 + $0x184] ss:$8 sps:$4 sm:$0xff]   ;;  %v2488_v4 = vld [vmem:[%s2847_s18 + $0x180] ss:$8 sps:$4 sm:$0xff]  }
  0x4b   : > { %1109 = vmatprep.subr.bf16.mxu0 %v2455_v46  ;;  %v2489_v5 = vld [vmem:[%s2847_s18 + $0x94] ss:$8 sps:$4 sm:$0xff]   ;;  %v2493_v7 = vld [vmem:[%s2847_s18 + $0x90] ss:$8 sps:$4 sm:$0xff]   ;;  %v2495_v9 = vld [vmem:[%s2847_s18 + $0xa4] ss:$8 sps:$4 sm:$0xff]  }
  0x4c   : > { %v2491_v6 = vld [vmem:[%s2847_s18 + $0x194] ss:$8 sps:$4 sm:$0xff]   ;;  %v2494_v8 = vld [vmem:[%s2847_s18 + $0x190] ss:$8 sps:$4 sm:$0xff]   ;;  %v2497_v10 = vld [vmem:[%s2847_s18 + $0x1a4] ss:$8 sps:$4 sm:$0xff]  }
  0x4d   : > { %997 = vmatpush1.bf16.msra.mxu1 %v2457_v47  ;;  %v2499_v11 = vld [vmem:[%s2847_s18 + $0xa0] ss:$8 sps:$4 sm:$0xff]   ;;  %v2501_v13 = vld [vmem:[%s2847_s18 + $0xb4] ss:$8 sps:$4 sm:$0xff]   ;;  %v2505_v15 = vld [vmem:[%s2847_s18 + $0xb0] ss:$8 sps:$4 sm:$0xff]  }
  0x4e   : > { %1110 = vmatpush1.bf16.msra.mxu0 %v2458_v48  ;;  %998 = vmatprep.subr.bf16.mxu1 %v2459_v49  ;;  %v2500_v12 = vld [vmem:[%s2847_s18 + $0x1a0] ss:$8 sps:$4 sm:$0xff]   ;;  %v2503_v14 = vld [vmem:[%s2847_s18 + $0x1b4] ss:$8 sps:$4 sm:$0xff]   ;;  %v2506_v16 = vld [vmem:[%s2847_s18 + $0x1b0] ss:$8 sps:$4 sm:$0xff]  }
  0x4f   : > { %1111 = vmatprep.subr.bf16.mxu0 %v2461_v50  ;;  %v2507_v17 = vld [vmem:[%s2847_s18 + $0xc4] ss:$8 sps:$4 sm:$0xff]   ;;  %v2511_v21 = vld [vmem:[%s2847_s18 + $0xc0] ss:$8 sps:$4 sm:$0xff]   ;;  %v2513_v23 = vld [vmem:[%s2847_s18 + $0xd4] ss:$8 sps:$4 sm:$0xff]  }
  0x50   : > { %v2533_v18 = vld [vmem:[%s2849_s19 + $0x4] ss:$16 sps:$4 sm:$0xff]   ;;  %v2536_v20 = vld [vmem:[%s2849_s19 + $0xc] ss:$16 sps:$4 sm:$0xff]   ;;  %v2512_v22 = vld [vmem:[%s2847_s18 + $0x1c0] ss:$8 sps:$4 sm:$0xff]  }
  0x51   : > { %999 = vmatpush1.bf16.msra.mxu1 %v2463_v51  ;;  %v2509_v19 = vld [vmem:[%s2847_s18 + $0x1c4] ss:$8 sps:$4 sm:$0xff]   ;;  %1022 = vmatprep.mubr.bf16.mxu1 %v2533_v18  ;;  %v2515_v24 = vld [vmem:[%s2847_s18 + $0x1d4] ss:$8 sps:$4 sm:$0xff]   ;;  %v2517_v25 = vld [vmem:[%s2847_s18 + $0xd0] ss:$8 sps:$4 sm:$0xff]  }
  0x52   : > { %1112 = vmatpush1.bf16.msra.mxu0 %v2464_v52  ;;  %1000 = vmatprep.subr.bf16.mxu1 %v2465_v53  ;;  %v2518_v26 = vld [vmem:[%s2847_s18 + $0x1d0] ss:$8 sps:$4 sm:$0xff]   ;;  %v2519_v27 = vld [vmem:[%s2847_s18 + $0xe4] ss:$8 sps:$4 sm:$0xff]   ;;  %v2523_v29 = vld [vmem:[%s2847_s18 + $0xe0] ss:$8 sps:$4 sm:$0xff]  }
  0x53   : > { %1113 = vmatprep.subr.bf16.mxu0 %v2467_v54  ;;  %1135 = vmatprep.mubr.bf16.mxu0 %v2536_v20  ;;  %v2521_v28 = vld [vmem:[%s2847_s18 + $0x1e4] ss:$8 sps:$4 sm:$0xff]   ;;  %v2524_v30 = vld [vmem:[%s2847_s18 + $0x1e0] ss:$8 sps:$4 sm:$0xff]   ;;  %v2525_v31 = vld [vmem:[%s2847_s18 + $0xf4] ss:$8 sps:$4 sm:$0xff]  }
  0x54   : > { %v2527_v32 = vld [vmem:[%s2847_s18 + $0x1f4] ss:$8 sps:$4 sm:$0xff]   ;;  %v2529_v33 = vld [vmem:[%s2847_s18 + $0xf0] ss:$8 sps:$4 sm:$0xff]   ;;  %p2250_p10 = scmp.ne.s32.totalorder %s2752_s24, 2 }
  0x55   : > { %1001 = vmatpush1.bf16.msra.mxu1 %v2469_v55  ;;  %v2530_v34 = vld [vmem:[%s2847_s18 + $0x1f0] ss:$8 sps:$4 sm:$0xff]   ;;  %v2537_v37 = vld [vmem:[%s2849_s19 + $0x24] ss:$16 sps:$4 sm:$0xff]   ;;  %v2539_v38 = vld [vmem:[%s2849_s19 + $0x2c] ss:$16 sps:$4 sm:$0xff]  }
  0x56   : > { %1114 = vmatpush1.bf16.msra.mxu0 %v2470_v56  ;;  %1002 = vmatprep.subr.bf16.mxu1 %v2471_v57  ;;  %v2531_v35 = vld [vmem:[%s2849_s19] ss:$16 sps:$4 sm:$0xff]   ;;  %v2534_v36 = vld [vmem:[%s2849_s19 + $0x8] ss:$16 sps:$4 sm:$0xff]   ;;  %v2543_v41 = vld [vmem:[%s2849_s19 + $0x44] ss:$16 sps:$4 sm:$0xff]  }
  0x57   : > { %1115 = vmatprep.subr.bf16.mxu0 %v2473_v58  ;;  %v2541_v39 = vld [vmem:[%s2849_s19 + $0x20] ss:$16 sps:$4 sm:$0xff]   ;;  %v2542_v40 = vld [vmem:[%s2849_s19 + $0x28] ss:$16 sps:$4 sm:$0xff]   ;;  %v2545_v42 = vld [vmem:[%s2849_s19 + $0x4c] ss:$16 sps:$4 sm:$0xff]  }
  0x58   : > { %v2547_v43 = vld [vmem:[%s2849_s19 + $0x40] ss:$16 sps:$4 sm:$0xff]   ;;  %v2548_v44 = vld [vmem:[%s2849_s19 + $0x48] ss:$16 sps:$4 sm:$0xff]   ;;  %v2549_v45 = vld [vmem:[%s2849_s19 + $0x64] ss:$16 sps:$4 sm:$0xff]  }
  0x59   : > { %1003 = vmatpush1.bf16.msra.mxu1 %v2475_v59  ;;  %v2551_v46 = vld [vmem:[%s2849_s19 + $0x6c] ss:$16 sps:$4 sm:$0xff]   ;;  %v2553_v47 = vld [vmem:[%s2849_s19 + $0x60] ss:$16 sps:$4 sm:$0xff]   ;;  %v2554_v48 = vld [vmem:[%s2849_s19 + $0x68] ss:$16 sps:$4 sm:$0xff]  }
  0x5a   : > { %1116 = vmatpush1.bf16.msra.mxu0 %v2476_v60  ;;  %1004 = vmatprep.subr.bf16.mxu1 %v2477_v61  ;;  %v2555_v49 = vld [vmem:[%s2849_s19 + $0x84] ss:$16 sps:$4 sm:$0xff]   ;;  %v2557_v50 = vld [vmem:[%s2849_s19 + $0x8c] ss:$16 sps:$4 sm:$0xff]   ;;  %v2559_v51 = vld [vmem:[%s2849_s19 + $0x80] ss:$16 sps:$4 sm:$0xff]  }
  0x5b   : > { %1117 = vmatprep.subr.bf16.mxu0 %v2479_v62  ;;  %v2560_v52 = vld [vmem:[%s2849_s19 + $0x88] ss:$16 sps:$4 sm:$0xff]   ;;  %v2561_v53 = vld [vmem:[%s2849_s19 + $0xa4] ss:$16 sps:$4 sm:$0xff]   ;;  %v2563_v54 = vld [vmem:[%s2849_s19 + $0xac] ss:$16 sps:$4 sm:$0xff]  }
  0x5c   : > { %v2565_v55 = vld [vmem:[%s2849_s19 + $0xa0] ss:$16 sps:$4 sm:$0xff]   ;;  %v2566_v56 = vld [vmem:[%s2849_s19 + $0xa8] ss:$16 sps:$4 sm:$0xff]   ;;  %v2567_v57 = vld [vmem:[%s2849_s19 + $0xc4] ss:$16 sps:$4 sm:$0xff]  }
  0x5d   : > { %1005 = vmatpush1.bf16.msra.mxu1 %v2481_v63  ;;  %v2569_v58 = vld [vmem:[%s2849_s19 + $0xcc] ss:$16 sps:$4 sm:$0xff]   ;;  %v2571_v59 = vld [vmem:[%s2849_s19 + $0xc0] ss:$16 sps:$4 sm:$0xff]   ;;  %v2572_v60 = vld [vmem:[%s2849_s19 + $0xc8] ss:$16 sps:$4 sm:$0xff]  }
  0x5e   : > { %1118 = vmatpush1.bf16.msra.mxu0 %v2482_v0  ;;  %1006 = vmatprep.subr.bf16.mxu1 %v2483_v1  ;;  %v2573_v61 = vld [vmem:[%s2849_s19 + $0xe4] ss:$16 sps:$4 sm:$0xff]   ;;  %v2575_v62 = vld [vmem:[%s2849_s19 + $0xec] ss:$16 sps:$4 sm:$0xff]   ;;  %v2577_v63 = vld [vmem:[%s2849_s19 + $0xe0] ss:$16 sps:$4 sm:$0xff]  }
  0x5f   : > { %1119 = vmatprep.subr.bf16.mxu0 %v2485_v2  ;;  %v2578_v0 = vld [vmem:[%s2849_s19 + $0xe8] ss:$16 sps:$4 sm:$0xff]   ;;  %v382_v2 = vld [vmem:[#allocation2] sm:$0xff] }
  0x61   : > { %1007 = vmatpush1.bf16.msra.mxu1 %v2487_v3 }
  0x62   : > { %1120 = vmatpush1.bf16.msra.mxu0 %v2488_v4  ;;  %1008 = vmatprep.subr.bf16.mxu1 %v2489_v5 }
  0x63   : > { %1121 = vmatprep.subr.bf16.mxu0 %v2491_v6  ;;  %v383_v6 = vld [vmem:[#allocation2 + $0x8] sm:$0xff] }
  0x65   : > { %1009 = vmatpush1.bf16.msra.mxu1 %v2493_v7 }
  0x66   : > { %1122 = vmatpush1.bf16.msra.mxu0 %v2494_v8  ;;  %1010 = vmatprep.subr.bf16.mxu1 %v2495_v9 }
  0x67   : > { %1123 = vmatprep.subr.bf16.mxu0 %v2497_v10  ;;  %v384_v10 = vld [vmem:[#allocation2 + $0x10] sm:$0xff] }
  0x69   : > { %1011 = vmatpush1.bf16.msra.mxu1 %v2499_v11 }
  0x6a   : > { %1124 = vmatpush1.bf16.msra.mxu0 %v2500_v12  ;;  %1012 = vmatprep.subr.bf16.mxu1 %v2501_v13 }
  0x6b   : > { %1125 = vmatprep.subr.bf16.mxu0 %v2503_v14 }
  0x6d   : > { %1013 = vmatpush1.bf16.msra.mxu1 %v2505_v15  ;;  %v385_v15 = vld [vmem:[#allocation2 + $0x18] sm:$0xff] }
  0x6e   : > { %1126 = vmatpush1.bf16.msra.mxu0 %v2506_v16  ;;  %1014 = vmatprep.subr.bf16.mxu1 %v2507_v17 }
  0x6f   : > { %1127 = vmatprep.subr.bf16.mxu0 %v2509_v19 }
  0x71   : > { %1015 = vmatpush1.bf16.msra.mxu1 %v2511_v21 }
  0x72   : > { %1128 = vmatpush1.bf16.msra.mxu0 %v2512_v22  ;;  %1016 = vmatprep.subr.bf16.mxu1 %v2513_v23  ;;  %v386_v22 = vld [vmem:[#allocation2 + $0x20] sm:$0xff] }
  0x73   : > { %1129 = vmatprep.subr.bf16.mxu0 %v2515_v24 }
  0x75   : > { %1017 = vmatpush1.bf16.msra.mxu1 %v2517_v25 }
  0x76   : > { %1130 = vmatpush1.bf16.msra.mxu0 %v2518_v26  ;;  %1018 = vmatprep.subr.bf16.mxu1 %v2519_v27  ;;  %v387_v26 = vld [vmem:[#allocation2 + $0x28] sm:$0xff] }
  0x77   : > { %1131 = vmatprep.subr.bf16.mxu0 %v2521_v28 }
  0x79   : > { %1019 = vmatpush1.bf16.msra.mxu1 %v2523_v29 }
  0x7a   : > { %1132 = vmatpush1.bf16.msra.mxu0 %v2524_v30  ;;  %1020 = vmatprep.subr.bf16.mxu1 %v2525_v31  ;;  %v388_v30 = vld [vmem:[#allocation2 + $0x30] sm:$0xff] }
  0x7b   : > { %1133 = vmatprep.subr.bf16.mxu0 %v2527_v32 }
  0x7d   : > { %1021 = vmatpush1.bf16.msra.mxu1 %v2529_v33 }
  0x7e   : > { %1134 = vmatpush1.bf16.msra.mxu0 %v2530_v34 }
  0x80   : > { %1023 = vmatmul.mubr.bf16.vlgmr.msra.gmra.mrb[0].mxu1 %v2531_v35  ;;  %v389_v35 = vld [vmem:[#allocation2 + $0x38] sm:$0xff] }
  0x81   : > { %1136 = vmatmul.mubr.bf16.vlgmr.msra.gmra.mrb[0].mxu0 %v2534_v36  ;;  %1032 = vmatprep.mubr.bf16.mxu1 %v2537_v37 }
  0x82   : > { %1145 = vmatprep.mubr.bf16.mxu0 %v2539_v38 }
  0x88   : > { %1033 = vmatmul.mubr.bf16.gmra.mrb[4].mxu1 %v2541_v39 }
  0x89   : > { %1146 = vmatmul.mubr.bf16.gmra.mrb[4].mxu0 %v2542_v40  ;;  %1042 = vmatprep.mubr.bf16.mxu1 %v2543_v41 }
  0x8a   : > { %1155 = vmatprep.mubr.bf16.mxu0 %v2545_v42  ;;  %v390_v42 = vld [vmem:[#allocation2 + $0x40] sm:$0xff] }
  0x90   : > { %1043 = vmatmul.mubr.bf16.gmra.mrb[8].mxu1 %v2547_v43 }
  0x91   : > { %1156 = vmatmul.mubr.bf16.gmra.mrb[8].mxu0 %v2548_v44  ;;  %1052 = vmatprep.mubr.bf16.mxu1 %v2549_v45 }
  0x92   : > { %1165 = vmatprep.mubr.bf16.mxu0 %v2551_v46  ;;  %v391_v46 = vld [vmem:[#allocation2 + $0x48] sm:$0xff] }
  0x98   : > { %1053 = vmatmul.mubr.bf16.gmra.mrb[12].mxu1 %v2553_v47 }
  0x99   : > { %1166 = vmatmul.mubr.bf16.gmra.mrb[12].mxu0 %v2554_v48  ;;  %1062 = vmatprep.mubr.bf16.mxu1 %v2555_v49 }
  0x9a   : > { %1175 = vmatprep.mubr.bf16.mxu0 %v2557_v50  ;;  %v392_v50 = vld [vmem:[#allocation2 + $0x50] sm:$0xff] }
  0xa0   : > { %1063 = vmatmul.mubr.bf16.gmra.mrb[16].mxu1 %v2559_v51 }
  0xa1   : > { %1176 = vmatmul.mubr.bf16.gmra.mrb[16].mxu0 %v2560_v52  ;;  %1072 = vmatprep.mubr.bf16.mxu1 %v2561_v53 }
  0xa2   : > { %1185 = vmatprep.mubr.bf16.mxu0 %v2563_v54 }
  0xa8   : > { %1073 = vmatmul.mubr.bf16.gmra.mrb[20].mxu1 %v2565_v55  ;;  %v393_v55 = vld [vmem:[#allocation2 + $0x58] sm:$0xff] }
  0xa9   : > { %1186 = vmatmul.mubr.bf16.gmra.mrb[20].mxu0 %v2566_v56  ;;  %1082 = vmatprep.mubr.bf16.mxu1 %v2567_v57 }
  0xaa   : > { %1195 = vmatprep.mubr.bf16.mxu0 %v2569_v58 }
  0xb0   : > { %1083 = vmatmul.mubr.bf16.gmra.mrb[24].mxu1 %v2571_v59 }
  0xb1   : > { %1196 = vmatmul.mubr.bf16.gmra.mrb[24].mxu0 %v2572_v60  ;;  %1092 = vmatprep.mubr.bf16.mxu1 %v2573_v61 }
  0xb2   : > { %1205 = vmatprep.mubr.bf16.mxu0 %v2575_v62  ;;  %v394_v62 = vld [vmem:[#allocation2 + $0x60] sm:$0xff] }
  0xb8   : > { %1093 = vmatmul.mubr.bf16.gmra.mrb[28].mxu1 %v2577_v63 }
  0xb9   : > { %1206 = vmatmul.mubr.bf16.gmra.mrb[28].mxu0 %v2578_v0 }
 0x153   : > { %v1024_v1 = vpop.f32.mrb[0].mxu1 }
 0x154   : > { %v1137_v3 = vpop.f32.mrb[0].mxu0  ;;  %v1026_v5 = vpop.f32.mrb[1].mxu1 }
 0x155   : > { %v1138_v4 = vadd.f32 %v1137_v3, %v1024_v1  ;;  %v1139_v7 = vpop.f32.mrb[1].mxu0  ;;  %v1028_v9 = vpop.f32.mrb[2].mxu1 }
 0x156   : > { %v1140_v8 = vadd.f32 %v1139_v7, %v1026_v5  ;;  %v1141_v11 = vpop.f32.mrb[2].mxu0  ;;  %v1030_v14 = vpop.f32.mrb[3].mxu1 }
 0x157   : > { %v1216_v12 = vadd.f32 %v1138_v4, %v382_v2  ;;  %v1142_v13 = vadd.f32 %v1141_v11, %v1028_v9  ;;  %v1143_v16 = vpop.f32.mrb[3].mxu0  ;;  %v395_v2 = vld [vmem:[#allocation2 + $0x68] sm:$0xff]  ;;  %v397_v11 = vld [vmem:[#allocation2 + $0x78] sm:$0xff] }
 0x158   : > { %v1217_v17 = vadd.f32 %v1140_v8, %v383_v6  ;;  %v1144_v18 = vadd.f32 %v1143_v16, %v1030_v14  ;;  %v396_v6 = vld [vmem:[#allocation2 + $0x70] sm:$0xff] }
 0x159   : > { %1248 = vst [vmem:[#allocation2] sm:$0xff] %v1216_v12  ;;  %v1218_v19 = vadd.f32 %v1142_v13, %v384_v10 }
 0x15a   : > { %1249 = vst [vmem:[#allocation2 + $0x8] sm:$0xff] %v1217_v17  ;;  %v1219_v20 = vadd.f32 %v1144_v18, %v385_v15  ;;  %v398_v18 = vld [vmem:[#allocation2 + $0x80] sm:$0xff] }
 0x15b   : > { %1250 = vst [vmem:[#allocation2 + $0x10] sm:$0xff] %v1218_v19  ;;  %v1034_v21 = vpop.f32.mrb[4].mxu1 }
 0x15c   : > { %1251 = vst [vmem:[#allocation2 + $0x18] sm:$0xff] %v1219_v20  ;;  %v1147_v23 = vpop.f32.mrb[4].mxu0  ;;  %v1036_v25 = vpop.f32.mrb[5].mxu1 }
 0x15d   : > { %v1148_v24 = vadd.f32 %v1147_v23, %v1034_v21  ;;  %v1149_v27 = vpop.f32.mrb[5].mxu0  ;;  %v1038_v29 = vpop.f32.mrb[6].mxu1 }
 0x15e   : > { %v1150_v28 = vadd.f32 %v1149_v27, %v1036_v25  ;;  %v1151_v31 = vpop.f32.mrb[6].mxu0  ;;  %v1040_v34 = vpop.f32.mrb[7].mxu1 }
 0x15f   : > { %v1220_v32 = vadd.f32 %v1148_v24, %v386_v22  ;;  %v1152_v33 = vadd.f32 %v1151_v31, %v1038_v29  ;;  %v1153_v36 = vpop.f32.mrb[7].mxu0  ;;  %v399_v22 = vld [vmem:[#allocation2 + $0x88] sm:$0xff]  ;;  %v401_v31 = vld [vmem:[#allocation2 + $0x98] sm:$0xff] }
 0x160   : > { %v1221_v37 = vadd.f32 %v1150_v28, %v387_v26  ;;  %v1154_v38 = vadd.f32 %v1153_v36, %v1040_v34  ;;  %v400_v26 = vld [vmem:[#allocation2 + $0x90] sm:$0xff] }
 0x161   : > { %1252 = vst [vmem:[#allocation2 + $0x20] sm:$0xff] %v1220_v32  ;;  %v1222_v39 = vadd.f32 %v1152_v33, %v388_v30 }
 0x162   : > { %1253 = vst [vmem:[#allocation2 + $0x28] sm:$0xff] %v1221_v37  ;;  %v1223_v40 = vadd.f32 %v1154_v38, %v389_v35  ;;  %v402_v38 = vld [vmem:[#allocation2 + $0xa0] sm:$0xff] }
 0x163   : > { %1254 = vst [vmem:[#allocation2 + $0x30] sm:$0xff] %v1222_v39  ;;  %v1044_v41 = vpop.f32.mrb[8].mxu1 }
 0x164   : > { %1255 = vst [vmem:[#allocation2 + $0x38] sm:$0xff] %v1223_v40  ;;  %v1157_v43 = vpop.f32.mrb[8].mxu0  ;;  %v1046_v45 = vpop.f32.mrb[9].mxu1 }
 0x165   : > { %v1158_v44 = vadd.f32 %v1157_v43, %v1044_v41  ;;  %v1159_v47 = vpop.f32.mrb[9].mxu0  ;;  %v1048_v49 = vpop.f32.mrb[10].mxu1 }
 0x166   : > { %v1160_v48 = vadd.f32 %v1159_v47, %v1046_v45  ;;  %v1161_v51 = vpop.f32.mrb[10].mxu0  ;;  %v1050_v54 = vpop.f32.mrb[11].mxu1 }
 0x167   : > { %v1224_v52 = vadd.f32 %v1158_v44, %v390_v42  ;;  %v1162_v53 = vadd.f32 %v1161_v51, %v1048_v49  ;;  %v1163_v56 = vpop.f32.mrb[11].mxu0  ;;  %v403_v42 = vld [vmem:[#allocation2 + $0xa8] sm:$0xff]  ;;  %v405_v51 = vld [vmem:[#allocation2 + $0xb8] sm:$0xff] }
 0x168   : > { %v1225_v57 = vadd.f32 %v1160_v48, %v391_v46  ;;  %v1164_v58 = vadd.f32 %v1163_v56, %v1050_v54  ;;  %v404_v46 = vld [vmem:[#allocation2 + $0xb0] sm:$0xff] }
 0x169   : > { %1256 = vst [vmem:[#allocation2 + $0x40] sm:$0xff] %v1224_v52  ;;  %v1226_v59 = vadd.f32 %v1162_v53, %v392_v50 }
 0x16a   : > { %1257 = vst [vmem:[#allocation2 + $0x48] sm:$0xff] %v1225_v57  ;;  %v1227_v60 = vadd.f32 %v1164_v58, %v393_v55  ;;  %v406_v58 = vld [vmem:[#allocation2 + $0xc0] sm:$0xff] }
 0x16b   : > { %1258 = vst [vmem:[#allocation2 + $0x50] sm:$0xff] %v1226_v59  ;;  %v1054_v61 = vpop.f32.mrb[12].mxu1 }
 0x16c   : > { %1259 = vst [vmem:[#allocation2 + $0x58] sm:$0xff] %v1227_v60  ;;  %v1167_v63 = vpop.f32.mrb[12].mxu0  ;;  %v1056_v1 = vpop.f32.mrb[13].mxu1 }
 0x16d   : > { %v1168_v0 = vadd.f32 %v1167_v63, %v1054_v61  ;;  %v1169_v3 = vpop.f32.mrb[13].mxu0  ;;  %v1058_v5 = vpop.f32.mrb[14].mxu1 }
 0x16e   : > { %v1170_v4 = vadd.f32 %v1169_v3, %v1056_v1  ;;  %v1171_v7 = vpop.f32.mrb[14].mxu0  ;;  %v1060_v10 = vpop.f32.mrb[15].mxu1 }
 0x16f   : > { %v1228_v8 = vadd.f32 %v1168_v0, %v394_v62  ;;  %v1172_v9 = vadd.f32 %v1171_v7, %v1058_v5  ;;  %v1173_v12 = vpop.f32.mrb[15].mxu0  ;;  %v407_v62 = vld [vmem:[#allocation2 + $0xc8] sm:$0xff]  ;;  %v409_v7 = vld [vmem:[#allocation2 + $0xd8] sm:$0xff] }
 0x170   : > { %v1229_v13 = vadd.f32 %v1170_v4, %v395_v2  ;;  %v1174_v14 = vadd.f32 %v1173_v12, %v1060_v10  ;;  %v408_v2 = vld [vmem:[#allocation2 + $0xd0] sm:$0xff] }
 0x171   : > { %1260 = vst [vmem:[#allocation2 + $0x60] sm:$0xff] %v1228_v8  ;;  %v1230_v15 = vadd.f32 %v1172_v9, %v396_v6 }
 0x172   : > { %1261 = vst [vmem:[#allocation2 + $0x68] sm:$0xff] %v1229_v13  ;;  %v1231_v16 = vadd.f32 %v1174_v14, %v397_v11  ;;  %v410_v14 = vld [vmem:[#allocation2 + $0xe0] sm:$0xff] }
 0x173   : > { %1262 = vst [vmem:[#allocation2 + $0x70] sm:$0xff] %v1230_v15  ;;  %v1064_v17 = vpop.f32.mrb[16].mxu1 }
 0x174   : > { %1263 = vst [vmem:[#allocation2 + $0x78] sm:$0xff] %v1231_v16  ;;  %v1177_v19 = vpop.f32.mrb[16].mxu0  ;;  %v1066_v21 = vpop.f32.mrb[17].mxu1 }
 0x175   : > { %v1178_v20 = vadd.f32 %v1177_v19, %v1064_v17  ;;  %v1179_v23 = vpop.f32.mrb[17].mxu0  ;;  %v1068_v25 = vpop.f32.mrb[18].mxu1 }
 0x176   : > { %v1180_v24 = vadd.f32 %v1179_v23, %v1066_v21  ;;  %v1181_v27 = vpop.f32.mrb[18].mxu0  ;;  %v1070_v30 = vpop.f32.mrb[19].mxu1 }
 0x177   : > { %v1232_v28 = vadd.f32 %v1178_v20, %v398_v18  ;;  %v1182_v29 = vadd.f32 %v1181_v27, %v1068_v25  ;;  %v1183_v32 = vpop.f32.mrb[19].mxu0  ;;  %v411_v18 = vld [vmem:[#allocation2 + $0xe8] sm:$0xff]  ;;  %v413_v27 = vld [vmem:[#allocation2 + $0xf8] sm:$0xff] }
 0x178   : > { %v1233_v33 = vadd.f32 %v1180_v24, %v399_v22  ;;  %v1184_v34 = vadd.f32 %v1183_v32, %v1070_v30  ;;  %v412_v22 = vld [vmem:[#allocation2 + $0xf0] sm:$0xff] }
 0x179   : > { %1264 = vst [vmem:[#allocation2 + $0x80] sm:$0xff] %v1232_v28  ;;  %v1234_v35 = vadd.f32 %v1182_v29, %v400_v26 }
 0x17a   : > { %1265 = vst [vmem:[#allocation2 + $0x88] sm:$0xff] %v1233_v33  ;;  %v1235_v36 = vadd.f32 %v1184_v34, %v401_v31  ;;  %v1300_v33 = vld [vmem:[#allocation2] sm:$0xff] (!%p2250_p10)  ;;  %v1302_v34 = vld [vmem:[#allocation2 + $0x10] sm:$0xff] (!%p2250_p10) }
 0x17b   : > { %1266 = vst [vmem:[#allocation2 + $0x90] sm:$0xff] %v1234_v35  ;;  %v1074_v37 = vpop.f32.mrb[20].mxu1  ;;  %v1304_v35 = vld [vmem:[#allocation2 + $0x20] sm:$0xff] (!%p2250_p10) }
 0x17c   : > { %1267 = vst [vmem:[#allocation2 + $0x98] sm:$0xff] %v1235_v36  ;;  %v1187_v39 = vpop.f32.mrb[20].mxu0  ;;  %v1076_v41 = vpop.f32.mrb[21].mxu1  ;;  %v1332_v36 = vpack.c.bf16 (!%p2250_p10), %v1302_v34, %v1300_v33 }
 0x17d   : > { %v1188_v40 = vadd.f32 %v1187_v39, %v1074_v37  ;;  %v1189_v43 = vpop.f32.mrb[21].mxu0  ;;  %v1078_v45 = vpop.f32.mrb[22].mxu1  ;;  %v1306_v37 = vld [vmem:[#allocation2 + $0x30] sm:$0xff] (!%p2250_p10)  ;;  %v1308_v39 = vld [vmem:[#allocation2 + $0x40] sm:$0xff] (!%p2250_p10) }
 0x17e   : > { %v1190_v44 = vadd.f32 %v1189_v43, %v1076_v41  ;;  %v1191_v47 = vpop.f32.mrb[22].mxu0  ;;  %v1080_v50 = vpop.f32.mrb[23].mxu1  ;;  %2313 = vmatprep.subr.bf16.mxu0 (!%p2250_p10), %v1332_v36  ;;  %v1312_v41 = vld [vmem:[#allocation2 + $0x60] sm:$0xff] (!%p2250_p10)  ;;  %v1314_v43 = vld [vmem:[#allocation2 + $0x70] sm:$0xff] (!%p2250_p10) }
 0x17f   : > { %v1236_v48 = vadd.f32 %v1188_v40, %v402_v38  ;;  %v1192_v49 = vadd.f32 %v1191_v47, %v1078_v45  ;;  %v1193_v52 = vpop.f32.mrb[23].mxu0  ;;  %v1333_v38 = vpack.c.bf16 (!%p2250_p10), %v1306_v37, %v1304_v35  ;;  %v1310_v40 = vld [vmem:[#allocation2 + $0x50] sm:$0xff] (!%p2250_p10)  ;;  %2314 = vmatpush3.bf16.msra.mxu0 (!%p2250_p10), %v1332_v36  ;;  %v1335_v45 = vpack.c.bf16 (!%p2250_p10), %v1314_v43, %v1312_v41  ;;  %v1313_v35 = vld [vmem:[#allocation2 + $0x68] sm:$0xff] (!%p2250_p10)  ;;  %v1311_v43 = vld [vmem:[#allocation2 + $0x58] sm:$0xff] (!%p2250_p10) }
 0x180   : > { %v1237_v53 = vadd.f32 %v1190_v44, %v403_v42  ;;  %v1194_v54 = vadd.f32 %v1193_v52, %v1080_v50  ;;  %v1334_v42 = vpack.c.bf16 (!%p2250_p10), %v1310_v40, %v1308_v39  ;;  %v2952_v44 = vld [vmem:[%s3512_s2] sm:$0xff] (!%p2250_p10)   ;;  %v1309_v36 = vld [vmem:[#allocation2 + $0x48] sm:$0xff] (!%p2250_p10)  ;;  %v1315_v40 = vld [vmem:[#allocation2 + $0x78] sm:$0xff] (!%p2250_p10) }
 0x181   : > { %1268 = vst [vmem:[#allocation2 + $0xa0] sm:$0xff] %v1236_v48  ;;  %v1238_v55 = vadd.f32 %v1192_v49, %v404_v46  ;;  %2315 = vmatprep.subr.bf16.mxu0 (!%p2250_p10), %v1333_v38  ;;  %2329 = vmatprep.mubr.bf16.mxu0 (!%p2250_p10), %v2952_v44  ;;  %v1316_v46 = vld [vmem:[#allocation2 + $0x80] sm:$0xff] (!%p2250_p10) }
 0x182   : > { %1269 = vst [vmem:[#allocation2 + $0xa8] sm:$0xff] %v1237_v53  ;;  %v1239_v56 = vadd.f32 %v1194_v54, %v405_v51  ;;  %v1318_v47 = vld [vmem:[#allocation2 + $0x90] sm:$0xff] (!%p2250_p10)  ;;  %v2587_v51 = vld [vmem:[%s3514_s4 + $0x4] ss:$8 sps:$4 sm:$0xff] (!%p2250_p10)   ;;  %v2589_v52 = vld [vmem:[%s3514_s4] ss:$8 sps:$4 sm:$0xff] (!%p2250_p10)  }
 0x183   : > { %1270 = vst [vmem:[#allocation2 + $0xb0] sm:$0xff] %v1238_v55  ;;  %v1084_v57 = vpop.f32.mrb[24].mxu1  ;;  %2316 = vmatpush3.bf16.msra.mxu0 (!%p2250_p10), %v1333_v38  ;;  %v1336_v49 = vpack.c.bf16 (!%p2250_p10), %v1318_v47, %v1316_v46  ;;  %v2590_v53 = vld [vmem:[%s3514_s4 + $0x14] ss:$8 sps:$4 sm:$0xff] (!%p2250_p10)   ;;  %1612 = vmatprep.subr.bf16.mxu1 (!%p2250_p10), %v2587_v51 }
 0x184   : > { %1271 = vst [vmem:[#allocation2 + $0xb8] sm:$0xff] %v1239_v56  ;;  %v1197_v59 = vpop.f32.mrb[24].mxu0  ;;  %v1086_v61 = vpop.f32.mrb[25].mxu1  ;;  %2317 = vmatprep.subr.bf16.mxu0 (!%p2250_p10), %v1334_v42  ;;  %1613 = vmatpush1.bf16.msra.mxu1 (!%p2250_p10), %v2589_v52  ;;  %v2592_v56 = vld [vmem:[%s3514_s4 + $0x10] ss:$8 sps:$4 sm:$0xff] (!%p2250_p10)  }
 0x185   : > { %v1198_v60 = vadd.f32 %v1197_v59, %v1084_v57  ;;  %v1199_v63 = vpop.f32.mrb[25].mxu0  ;;  %v1088_v1 = vpop.f32.mrb[26].mxu1  ;;  %1614 = vmatprep.subr.bf16.mxu1 (!%p2250_p10), %v2590_v53 }
 0x186   : > { %v1200_v0 = vadd.f32 %v1199_v63, %v1086_v61  ;;  %v1201_v3 = vpop.f32.mrb[26].mxu0  ;;  %v1090_v6 = vpop.f32.mrb[27].mxu1  ;;  %v2596_v63 = vld [vmem:[%s3514_s4 + $0x34] ss:$8 sps:$4 sm:$0xff] (!%p2250_p10)  }
 0x187   : > { %v1240_v4 = vadd.f32 %v1198_v60, %v406_v58  ;;  %v1202_v5 = vadd.f32 %v1201_v3, %v1088_v1  ;;  %v1203_v8 = vpop.f32.mrb[27].mxu0  ;;  %2318 = vmatpush3.bf16.msra.mxu0 (!%p2250_p10), %v1334_v42  ;;  %v2593_v58 = vld [vmem:[%s3514_s4 + $0x24] ss:$8 sps:$4 sm:$0xff] (!%p2250_p10)   ;;  %v2598_v1 = vld [vmem:[%s3514_s4 + $0x30] ss:$8 sps:$4 sm:$0xff] (!%p2250_p10)  }
 0x188   : > { %v1241_v9 = vadd.f32 %v1200_v0, %v407_v62  ;;  %v1204_v10 = vadd.f32 %v1203_v8, %v1090_v6  ;;  %v1320_v48 = vld [vmem:[#allocation2 + $0xa0] sm:$0xff] (!%p2250_p10)  ;;  %2319 = vmatprep.subr.bf16.mxu0 (!%p2250_p10), %v1335_v45  ;;  %1615 = vmatpush1.bf16.msra.mxu1 (!%p2250_p10), %v2592_v56  ;;  %v2996_v6 = vld [vmem:[%s3512_s2 + $0x10] sm:$0xff] (!%p2250_p10)   ;;  %v3006_v8 = vld [vmem:[%s3512_s2 + $0x18] sm:$0xff] (!%p2250_p10)  }
 0x189   : > { %1272 = vst [vmem:[#allocation2 + $0xc0] sm:$0xff] %v1240_v4  ;;  %v1242_v11 = vadd.f32 %v1202_v5, %v408_v2  ;;  %v2595_v62 = vld [vmem:[%s3514_s4 + $0x20] ss:$8 sps:$4 sm:$0xff] (!%p2250_p10)   ;;  %1616 = vmatprep.subr.bf16.mxu1 (!%p2250_p10), %v2593_v58  ;;  %v2599_v2 = vld [vmem:[%s3514_s4 + $0x44] ss:$8 sps:$4 sm:$0xff] (!%p2250_p10)  }
 0x18a   : > { %1273 = vst [vmem:[#allocation2 + $0xc8] sm:$0xff] %v1241_v9  ;;  %v1243_v12 = vadd.f32 %v1204_v10, %v409_v7  ;;  %v1322_v50 = vld [vmem:[#allocation2 + $0xb0] sm:$0xff] (!%p2250_p10)  ;;  %v2601_v3 = vld [vmem:[%s3514_s4 + $0x40] ss:$8 sps:$4 sm:$0xff] (!%p2250_p10)  }
 0x18b   : > { %1274 = vst [vmem:[#allocation2 + $0xd0] sm:$0xff] %v1242_v11  ;;  %v1094_v13 = vpop.f32.mrb[28].mxu1  ;;  %2320 = vmatpush3.bf16.msra.mxu0 (!%p2250_p10), %v1335_v45  ;;  %v1337_v55 = vpack.c.bf16 (!%p2250_p10), %v1322_v50, %v1320_v48  ;;  %v2602_v4 = vld [vmem:[%s3514_s4 + $0x54] ss:$8 sps:$4 sm:$0xff] (!%p2250_p10)   ;;  %v2991_v5 = vld [vmem:[%s3512_s2 + $0x8] sm:$0xff] (!%p2250_p10)   ;;  %v3011_v9 = vld [vmem:[%s3512_s2 + $0x20] sm:$0xff] (!%p2250_p10)  }
 0x18c   : > { %1275 = vst [vmem:[#allocation2 + $0xd8] sm:$0xff] %v1243_v12  ;;  %v1207_v15 = vpop.f32.mrb[28].mxu0  ;;  %v1096_v17 = vpop.f32.mrb[29].mxu1  ;;  %2321 = vmatprep.subr.bf16.mxu0 (!%p2250_p10), %v1336_v49  ;;  %1617 = vmatpush1.bf16.msra.mxu1 (!%p2250_p10), %v2595_v62  ;;  %v2604_v7 = vld [vmem:[%s3514_s4 + $0x50] ss:$8 sps:$4 sm:$0xff] (!%p2250_p10)   ;;  %v3018_v10 = vld [vmem:[%s3512_s2 + $0x28] sm:$0xff] (!%p2250_p10)  }
 0x18d   : > { %v1208_v16 = vadd.f32 %v1207_v15, %v1094_v13  ;;  %v1209_v19 = vpop.f32.mrb[29].mxu0  ;;  %v1098_v21 = vpop.f32.mrb[30].mxu1  ;;  %1618 = vmatprep.subr.bf16.mxu1 (!%p2250_p10), %v2596_v63  ;;  %v3023_v11 = vld [vmem:[%s3512_s2 + $0x30] sm:$0xff] (!%p2250_p10)   ;;  %v3030_v12 = vld [vmem:[%s3512_s2 + $0x38] sm:$0xff] (!%p2250_p10)   ;;  %v2605_v13 = vld [vmem:[%s3514_s4 + $0x64] ss:$8 sps:$4 sm:$0xff] (!%p2250_p10)  }
 0x18e   : > { %v1210_v20 = vadd.f32 %v1209_v19, %v1096_v17  ;;  %v1211_v23 = vpop.f32.mrb[30].mxu0  ;;  %v1100_v26 = vpop.f32.mrb[31].mxu1  ;;  %1283 = sbr.rel (%p2250_p10) target bundleno = 1481 (0x5c9), region = 75  ;;  %v2608_v15 = vld [vmem:[%s3514_s4 + $0x74] ss:$8 sps:$4 sm:$0xff] (!%p2250_p10)   ;;  %v2700_v17 = vmov (!%p2250_p10), 0  }
 0x18f   : > { %v1244_v24 = vadd.f32 %v1208_v16, %v410_v14  ;;  %v1212_v25 = vadd.f32 %v1211_v23, %v1098_v21  ;;  %v1213_v28 = vpop.f32.mrb[31].mxu0  ;;  %2322 = vmatpush3.bf16.msra.mxu0 (!%p2250_p10), %v1336_v49  ;;  %v2607_v14 = vld [vmem:[%s3514_s4 + $0x60] ss:$8 sps:$4 sm:$0xff] (!%p2250_p10)   ;;  %v2610_v16 = vld [vmem:[%s3514_s4 + $0x70] ss:$8 sps:$4 sm:$0xff] (!%p2250_p10)   ;;  %1644 = vmatprep.mubr.bf16.mxu1 (!%p2250_p10), %v2700_v17 }
 0x190   : > { %v1245_v29 = vadd.f32 %v1210_v20, %v411_v18  ;;  %v1214_v30 = vadd.f32 %v1213_v28, %v1100_v26  ;;  %v1324_v54 = vld [vmem:[#allocation2 + $0xc0] sm:$0xff] (!%p2250_p10)  ;;  %2323 = vmatprep.subr.bf16.mxu0 (!%p2250_p10), %v1337_v55  ;;  %1619 = vmatpush1.bf16.msra.mxu1 (!%p2250_p10), %v2598_v1  ;;  %v1305_v18 = vld [vmem:[#allocation2 + $0x28] sm:$0xff] (!%p2250_p10)  ;;  %v1307_v21 = vld [vmem:[#allocation2 + $0x38] sm:$0xff] (!%p2250_p10) }
 0x191   : > { %1276 = vst [vmem:[#allocation2 + $0xe0] sm:$0xff] %v1244_v24  ;;  %v1246_v31 = vadd.f32 %v1212_v25, %v412_v22  ;;  %1620 = vmatprep.subr.bf16.mxu1 (!%p2250_p10), %v2599_v2  ;;  %v1301_v19 = vld [vmem:[#allocation2 + $0x8] sm:$0xff] (!%p2250_p10)  ;;  %v1303_v24 = vld [vmem:[#allocation2 + $0x18] sm:$0xff] (!%p2250_p10)  ;;  %v3050_v25 = vld [vmem:[%s3513_s3] ss:$0 sm:$0xff] (!%p2250_p10) }
 0x192   : > { %1277 = vst [vmem:[#allocation2 + $0xe8] sm:$0xff] %v1245_v29  ;;  %v1247_v32 = vadd.f32 %v1214_v30, %v413_v27  ;;  %v1326_v57 = vld [vmem:[#allocation2 + $0xd0] sm:$0xff] (!%p2250_p10)  ;;  %v1321_v53 = vld [vmem:[#allocation2 + $0xa8] sm:$0xff] (!%p2250_p10)  ;;  %v1323_v58 = vld [vmem:[#allocation2 + $0xb8] sm:$0xff] (!%p2250_p10) }
 0x193   : > { %1278 = vst [vmem:[#allocation2 + $0xf0] sm:$0xff] %v1246_v31  ;;  %v1338_v61 = vpack.c.bf16 (!%p2250_p10), %v1326_v57, %v1324_v54  ;;  %2324 = vmatpush3.bf16.msra.mxu0 (!%p2250_p10), %v1337_v55  ;;  %v1317_v54 = vld [vmem:[#allocation2 + $0x88] sm:$0xff] (!%p2250_p10) }
 0x194   : > { %1279 = vst [vmem:[#allocation2 + $0xf8] sm:$0xff] %v1247_v32  ;;  %1621 = vmatpush1.bf16.msra.mxu1 (!%p2250_p10), %v2601_v3 }
 0x195   : > { %2325 = vmatprep.subr.bf16.mxu0 %v1338_v61  ;;  %1622 = vmatprep.subr.bf16.mxu1 %v2602_v4 }
 0x197   : > { %2326 = vmatpush3.bf16.msra.mxu0 %v1338_v61  ;;  %v1319_v61 = vld [vmem:[#allocation2 + $0x98] sm:$0xff] }
 0x198   : > { %v1328_v59 = vld [vmem:[#allocation2 + $0xe0] sm:$0xff]  ;;  %1623 = vmatpush1.bf16.msra.mxu1 %v2604_v7 }
 0x199   : > { %1624 = vmatprep.subr.bf16.mxu1 %v2605_v13 }
 0x19a   : > { %v1330_v60 = vld [vmem:[#allocation2 + $0xf0] sm:$0xff] }
 0x19b   : > { %v1339_v0 = vpack.c.bf16 %v1330_v60, %v1328_v59 }
 0x19c   : > { %1625 = vmatpush1.bf16.msra.mxu1 %v2607_v14  ;;  %v1329_v14 = vld [vmem:[#allocation2 + $0xe8] sm:$0xff] }
 0x19d   : > { %2327 = vmatprep.subr.bf16.mxu0 %v1339_v0  ;;  %1626 = vmatprep.subr.bf16.mxu1 %v2608_v15  ;;  %v1325_v15 = vld [vmem:[#allocation2 + $0xc8] sm:$0xff] }
 0x19e   : > { %2328 = vmatpush3.bf16.msra.mxu0 %v1339_v0 }
 0x1a0   : > { %1627 = vmatpush1.bf16.msra.mxu1 %v2610_v16 }
 0x1a1   : > { %2330 = vmatmul.mubr.bf16.vlgmr.msra.gmra.mrb[0].mxu0 %v2991_v5 }
 0x1a2   : > { %2333 = vmatprep.mubr.bf16.mxu0 %v2996_v6 }
 0x1a9   : > { %2334 = vmatmul.mubr.bf16.gmra.mrb[4].mxu0 %v3006_v8 }
 0x1aa   : > { %2337 = vmatprep.mubr.bf16.mxu0 %v3011_v9 }
 0x1b1   : > { %2338 = vmatmul.mubr.bf16.gmra.mrb[8].mxu0 %v3018_v10 }
 0x1b2   : > { %2341 = vmatprep.mubr.bf16.mxu0 %v3023_v11 }
 0x1b9   : > { %2342 = vmatmul.mubr.bf16.gmra.mrb[12].mxu0 %v3030_v12 }
 0x1ba   : > { %2361 = vmatprep.mubr.bf16.mxu0 %v2952_v44 }
 0x274   : > { %v2331_v20 = vpop.f32.mrb[0].mxu0 }
 0x275   : > { %v1431_v22 = vadd.f32 %v2331_v20, %v1305_v18  ;;  %v1422_v23 = vpop.f32.mrb[1].mxu0  ;;  %v1331_v20 = vld [vmem:[#allocation2 + $0xf8] sm:$0xff] }
 0x276   : > { %v1423_v26 = vadd.f32 %v1422_v23, %v1301_v19  ;;  %v2332_v27 = vpop.f32.mrb[2].mxu0  ;;  %v1327_v23 = vld [vmem:[#allocation2 + $0xd8] sm:$0xff] }
 0x277   : > { %v1434_v28 = vadd.f32 %v2332_v27, %v1307_v21  ;;  %v1425_v29 = vpop.f32.mrb[3].mxu0  ;;  %v1494_v31 = vadd.f32 %v3050_v25, %v1431_v22 }
 0x278   : > { %v1426_v30 = vadd.f32 %v1425_v29, %v1303_v24  ;;  %v1492_v33 = vadd.f32 %v3050_v25, %v1423_v26 }
 0x279   : > { %v1495_v32 = vadd.f32 %v3050_v25, %v1434_v28 }
 0x27a   : > { %v1493_v34 = vadd.f32 %v3050_v25, %v1426_v30 }
 0x27b   : > { %v1509_v37 = vpack.c.bf16 %v1495_v32, %v1494_v31 }
 0x27c   : > { %v1508_v38 = vpack.c.bf16 %v1493_v34, %v1492_v33  ;;  %v2335_v39 = vpop.f32.mrb[4].mxu0 }
 0x27d   : > { %v1447_v41 = vadd.f32 %v2335_v39, %v1313_v35  ;;  %v1438_v42 = vpop.f32.mrb[5].mxu0 }
 0x27e   : > { %1645 = vmatmul.mubr.bf16.vlgmr.msra.gmra.mrb[0].mxu1 %v1508_v38  ;;  %v1439_v44 = vadd.f32 %v1438_v42, %v1309_v36  ;;  %v2336_v45 = vpop.f32.mrb[6].mxu0 }
 0x27f   : > { %v1498_v46 = vadd.f32 %v3050_v25, %v1447_v41  ;;  %v1450_v47 = vadd.f32 %v2336_v45, %v1315_v40  ;;  %v1441_v48 = vpop.f32.mrb[7].mxu0  ;;  %1654 = vmatprep.mubr.bf16.mxu1 %v2700_v17 }
 0x280   : > { %v1496_v49 = vadd.f32 %v3050_v25, %v1439_v44  ;;  %v1442_v50 = vadd.f32 %v1441_v48, %v1311_v43 }
 0x281   : > { %v1499_v51 = vadd.f32 %v3050_v25, %v1450_v47 }
 0x282   : > { %v1497_v52 = vadd.f32 %v3050_v25, %v1442_v50 }
 0x283   : > { %v1511_v55 = vpack.c.bf16 %v1499_v51, %v1498_v46 }
 0x284   : > { %v1510_v56 = vpack.c.bf16 %v1497_v52, %v1496_v49  ;;  %v2339_v57 = vpop.f32.mrb[8].mxu0 }
 0x285   : > { %v1463_v59 = vadd.f32 %v2339_v57, %v1321_v53  ;;  %v1454_v60 = vpop.f32.mrb[9].mxu0 }
 0x286   : > { %1655 = vmatmul.mubr.bf16.gmra.mrb[4].mxu1 %v1509_v37  ;;  %v1455_v62 = vadd.f32 %v1454_v60, %v1317_v54  ;;  %v2340_v63 = vpop.f32.mrb[10].mxu0 }
 0x287   : > { %1664 = vmatprep.mubr.bf16.mxu1 %v2700_v17  ;;  %v1502_v0 = vadd.f32 %v3050_v25, %v1463_v59  ;;  %v1466_v1 = vadd.f32 %v2340_v63, %v1323_v58  ;;  %v1457_v2 = vpop.f32.mrb[11].mxu0 }
 0x288   : > { %v1500_v3 = vadd.f32 %v3050_v25, %v1455_v62  ;;  %v1458_v4 = vadd.f32 %v1457_v2, %v1319_v61 }
 0x289   : > { %v1503_v7 = vadd.f32 %v3050_v25, %v1466_v1 }
 0x28a   : > { %v1501_v13 = vadd.f32 %v3050_v25, %v1458_v4 }
 0x28b   : > { %v1513_v16 = vpack.c.bf16 %v1503_v7, %v1502_v0 }
 0x28c   : > { %v1512_v18 = vpack.c.bf16 %v1501_v13, %v1500_v3  ;;  %v2343_v19 = vpop.f32.mrb[12].mxu0 }
 0x28d   : > { %v1479_v21 = vadd.f32 %v2343_v19, %v1329_v14  ;;  %v1470_v22 = vpop.f32.mrb[13].mxu0 }
 0x28e   : > { %1665 = vmatmul.mubr.bf16.gmra.mrb[8].mxu1 %v1510_v56  ;;  %v1471_v24 = vadd.f32 %v1470_v22, %v1325_v15  ;;  %v2344_v26 = vpop.f32.mrb[14].mxu0 }
 0x28f   : > { %1674 = vmatprep.mubr.bf16.mxu1 %v2700_v17  ;;  %v1506_v27 = vadd.f32 %v3050_v25, %v1479_v21  ;;  %v1482_v28 = vadd.f32 %v2344_v26, %v1331_v20  ;;  %v1473_v29 = vpop.f32.mrb[15].mxu0  ;;  %v3113_v20 = vld [vmem:[%s3515_s5] ss:$0 sm:$0xff] }
 0x290   : > { %v1504_v30 = vadd.f32 %v3050_v25, %v1471_v24  ;;  %v1474_v31 = vadd.f32 %v1473_v29, %v1327_v23 }
 0x291   : > { %v1507_v32 = vadd.f32 %v3050_v25, %v1482_v28 }
 0x292   : > { %v1505_v33 = vadd.f32 %v3050_v25, %v1474_v31 }
 0x293   : > { %v1515_v34 = vpack.c.bf16 %v1507_v32, %v1506_v27 }
 0x294   : > { %v1514_v35 = vpack.c.bf16 %v1505_v33, %v1504_v30 }
 0x296   : > { %1675 = vmatmul.mubr.bf16.gmra.mrb[12].mxu1 %v1511_v55 }
 0x297   : > { %1684 = vmatprep.mubr.bf16.mxu1 %v2700_v17 }
 0x29e   : > { %1685 = vmatmul.mubr.bf16.gmra.mrb[16].mxu1 %v1512_v18  ;;  %v1869_v18 = vlaneseq }
 0x29f   : > { %1694 = vmatprep.mubr.bf16.mxu1 %v2700_v17 }
 0x2a6   : > { %1695 = vmatmul.mubr.bf16.gmra.mrb[20].mxu1 %v1513_v16 }
 0x2a7   : > { %1704 = vmatprep.mubr.bf16.mxu1 %v2700_v17 }
 0x2ae   : > { %1705 = vmatmul.mubr.bf16.gmra.mrb[24].mxu1 %v1514_v35 }
 0x2af   : > { %1714 = vmatprep.mubr.bf16.mxu1 %v2700_v17 }
 0x2b6   : > { %1715 = vmatmul.mubr.bf16.gmra.mrb[28].mxu1 %v1515_v34 }
 0x351   : > { %v1646_v36 = vpop.f32.mrb[0].mxu1 }
 0x352   : > { %v3075_v37 = vpop.f32.mrb[1].mxu1 }
 0x353   : > { %v1650_v38 = vpop.f32.mrb[2].mxu1 }
 0x354   : > { %v1725_v25 = vpack.c.bf16 %v1650_v38, %v1646_v36  ;;  %v3077_v39 = vpop.f32.mrb[3].mxu1 }
 0x356   : > { %2345 = vmatprep.subr.bf16.mxu0 %v1725_v25 }
 0x357   : > { %2346 = vmatpush3.bf16.msra.mxu0 %v1725_v25 }
 0x359   : > { %v1656_v40 = vpop.f32.mrb[4].mxu1 }
 0x35a   : > { %v1658_v41 = vpop.f32.mrb[5].mxu1 }
 0x35b   : > { %v1660_v42 = vpop.f32.mrb[6].mxu1 }
 0x35c   : > { %v1726_v43 = vpack.c.bf16 %v1660_v42, %v1656_v40  ;;  %v1662_v44 = vpop.f32.mrb[7].mxu1 }
 0x35e   : > { %2347 = vmatprep.subr.bf16.mxu0 %v1726_v43 }
 0x35f   : > { %2348 = vmatpush3.bf16.msra.mxu0 %v1726_v43 }
 0x361   : > { %v1666_v45 = vpop.f32.mrb[8].mxu1 }
 0x362   : > { %v3079_v46 = vpop.f32.mrb[9].mxu1 }
 0x363   : > { %v1670_v17 = vpop.f32.mrb[10].mxu1 }
 0x364   : > { %v1727_v47 = vpack.c.bf16 %v1670_v17, %v1666_v45  ;;  %v3081_v48 = vpop.f32.mrb[11].mxu1 }
 0x366   : > { %2349 = vmatprep.subr.bf16.mxu0 %v1727_v47 }
 0x367   : > { %2350 = vmatpush3.bf16.msra.mxu0 %v1727_v47 }
 0x369   : > { %v1676_v49 = vpop.f32.mrb[12].mxu1 }
 0x36a   : > { %v3083_v50 = vpop.f32.mrb[13].mxu1 }
 0x36b   : > { %v1680_v51 = vpop.f32.mrb[14].mxu1 }
 0x36c   : > { %v1728_v52 = vpack.c.bf16 %v1680_v51, %v1676_v49  ;;  %v3085_v53 = vpop.f32.mrb[15].mxu1 }
 0x36e   : > { %2351 = vmatprep.subr.bf16.mxu0 %v1728_v52 }
 0x36f   : > { %2352 = vmatpush3.bf16.msra.mxu0 %v1728_v52 }
 0x371   : > { %v1686_v54 = vpop.f32.mrb[16].mxu1 }
 0x372   : > { %v3087_v55 = vpop.f32.mrb[17].mxu1 }
 0x373   : > { %v1690_v56 = vpop.f32.mrb[18].mxu1 }
 0x374   : > { %v1729_v57 = vpack.c.bf16 %v1690_v56, %v1686_v54  ;;  %v3089_v58 = vpop.f32.mrb[19].mxu1 }
 0x376   : > { %2353 = vmatprep.subr.bf16.mxu0 %v1729_v57 }
 0x377   : > { %2354 = vmatpush3.bf16.msra.mxu0 %v1729_v57 }
 0x379   : > { %v1696_v59 = vpop.f32.mrb[20].mxu1 }
 0x37a   : > { %v3091_v60 = vpop.f32.mrb[21].mxu1 }
 0x37b   : > { %v1700_v61 = vpop.f32.mrb[22].mxu1 }
 0x37c   : > { %v1730_v62 = vpack.c.bf16 %v1700_v61, %v1696_v59  ;;  %v3093_v63 = vpop.f32.mrb[23].mxu1 }
 0x37e   : > { %2355 = vmatprep.subr.bf16.mxu0 %v1730_v62 }
 0x37f   : > { %2356 = vmatpush3.bf16.msra.mxu0 %v1730_v62 }
 0x381   : > { %v1706_v0 = vpop.f32.mrb[24].mxu1 }
 0x382   : > { %v3095_v1 = vpop.f32.mrb[25].mxu1 }
 0x383   : > { %v1710_v2 = vpop.f32.mrb[26].mxu1 }
 0x384   : > { %v1731_v3 = vpack.c.bf16 %v1710_v2, %v1706_v0  ;;  %v3097_v4 = vpop.f32.mrb[27].mxu1 }
 0x386   : > { %2357 = vmatprep.subr.bf16.mxu0 %v1731_v3 }
 0x387   : > { %2358 = vmatpush3.bf16.msra.mxu0 %v1731_v3 }
 0x389   : > { %v1716_v7 = vpop.f32.mrb[28].mxu1 }
 0x38a   : > { %v3099_v13 = vpop.f32.mrb[29].mxu1 }
 0x38b   : > { %v1720_v14 = vpop.f32.mrb[30].mxu1 }
 0x38c   : > { %v1732_v15 = vpack.c.bf16 %v1720_v14, %v1716_v7  ;;  %v3101_v16 = vpop.f32.mrb[31].mxu1 }
 0x38e   : > { %2359 = vmatprep.subr.bf16.mxu0 %v1732_v15 }
 0x38f   : > { %2360 = vmatpush3.bf16.msra.mxu0 %v1732_v15 }
 0x392   : > { %2362 = vmatmul.mubr.bf16.vlgmr.msra.gmra.mrb[16].mxu0 %v2991_v5  ;;  %v3115_v5 = vand.u32 127, %v1869_v18 }
 0x393   : > { %2365 = vmatprep.mubr.bf16.mxu0 %v2996_v6 }
 0x394   : > { %vm1871_vm0 = vcmp.lt.s32.totalorder %v3115_v5, 32 }
 0x39a   : > { %2366 = vmatmul.mubr.bf16.gmra.mrb[20].mxu0 %v3006_v8 }
 0x39b   : > { %2369 = vmatprep.mubr.bf16.mxu0 %v3011_v9 }
 0x3a2   : > { %2370 = vmatmul.mubr.bf16.gmra.mrb[24].mxu0 %v3018_v10 }
 0x3a3   : > { %2373 = vmatprep.mubr.bf16.mxu0 %v3023_v11 }
 0x3aa   : > { %2374 = vmatmul.mubr.bf16.gmra.mrb[28].mxu0 %v3030_v12 }
 0x465   : > { %v2363_v19 = vpop.f32.mrb[16].mxu0 }
 0x466   : > { %v1776_v6 = vadd.f32 %v2363_v19, %v1658_v41  ;;  %v1767_v21 = vpop.f32.mrb[17].mxu0 }
 0x467   : > { %v1768_v8 = vadd.f32 %v1767_v21, %v3075_v37  ;;  %v2364_v9 = vpop.f32.mrb[18].mxu0 }
 0x468   : > { %v3119_v10 = vadd.f32 %v3113_v20, %v1776_v6  ;;  %v1779_v11 = vadd.f32 %v2364_v9, %v1662_v44  ;;  %v1770_v22 = vpop.f32.mrb[19].mxu0 }
 0x469   : > { %v3122_v12 = vadd.f32 %v3113_v20, %v1768_v8  ;;  %v1771_v23 = vadd.f32 %v1770_v22, %v3077_v39 }
 0x46a   : > { %v3127_v24 = vadd.f32 %v3113_v20, %v1779_v11  ;;  %v1855_v26 = vmax.f32 %v3119_v10, 0.0 }
 0x46b   : > { %v3131_v27 = vadd.f32 %v3113_v20, %v1771_v23  ;;  %v1853_v28 = vmax.f32 %v3122_v12, 0.0 }
 0x46c   : > { %v3138_v29 = vsel %vm1871_vm0, %v1855_v26, -1e+30  ;;  %v1856_v30 = vmax.f32 %v3127_v24, 0.0 }
 0x46d   : > { %1892 = vmax.xlane.f32.xlu1 %v3138_v29  ;;  %v2367_v31 = vpop.f32.mrb[20].mxu0  ;;  %v3146_v32 = vsel %vm1871_vm0, %v1853_v28, -1e+30  ;;  %v1854_v33 = vmax.f32 %v3131_v27, 0.0 }
 0x46e   : > { %v1792_v34 = vadd.f32 %v2367_v31, %v3083_v50  ;;  %v1783_v35 = vpop.f32.mrb[21].mxu0  ;;  %1888 = vmax.xlane.f32.xlu0 %v3146_v32  ;;  %v3160_v40 = vsel %vm1871_vm0, %v1856_v30, -1e+30 }
 0x46f   : > { %v1784_v36 = vadd.f32 %v1783_v35, %v3079_v46  ;;  %v2368_v37 = vpop.f32.mrb[22].mxu0  ;;  %v3171_v43 = vsel %vm1871_vm0, %v1854_v33, -1e+30 }
 0x470   : > { %v3153_v38 = vadd.f32 %v3113_v20, %v1792_v34  ;;  %v1795_v25 = vadd.f32 %v2368_v37, %v3085_v53  ;;  %v1786_v39 = vpop.f32.mrb[23].mxu0 }
 0x471   : > { %v3163_v41 = vadd.f32 %v3113_v20, %v1784_v36  ;;  %v1787_v42 = vadd.f32 %v1786_v39, %v3081_v48  ;;  %1894 = vmax.xlane.f32.xlu1 %v3160_v40 }
 0x472   : > { %v3174_v44 = vadd.f32 %v3113_v20, %v1795_v25  ;;  %1890 = vmax.xlane.f32.xlu0 %v3171_v43  ;;  %v1859_v45 = vmax.f32 %v3153_v38, 0.0 }
 0x473   : > { %v3179_v46 = vadd.f32 %v3113_v20, %v1787_v42  ;;  %v1857_v49 = vmax.f32 %v3163_v41, 0.0 }
 0x474   : > { %v3185_v17 = vsel %vm1871_vm0, %v1859_v45, -1e+30  ;;  %v1860_v47 = vmax.f32 %v3174_v44, 0.0 }
 0x475   : > { %v2371_v48 = vpop.f32.mrb[24].mxu0  ;;  %v1858_v53 = vmax.f32 %v3179_v46, 0.0  ;;  %v3212_v0 = vsel %vm1871_vm0, %v1857_v49, -1e+30 }
 0x476   : > { %v1808_v50 = vadd.f32 %v2371_v48, %v3091_v60  ;;  %v1799_v51 = vpop.f32.mrb[25].mxu0  ;;  %1900 = vmax.xlane.f32.xlu0 %v3185_v17  ;;  %v3195_v52 = vsel %vm1871_vm0, %v1860_v47, -1e+30 }
 0x477   : > { %v1800_v54 = vadd.f32 %v1799_v51, %v3087_v55  ;;  %1902 = vmax.xlane.f32.xlu1 %v3195_v52  ;;  %v2372_v56 = vpop.f32.mrb[26].mxu0 }
 0x478   : > { %v3201_v57 = vadd.f32 %v3113_v20, %v1808_v50  ;;  %v1811_v59 = vadd.f32 %v2372_v56, %v3093_v63  ;;  %v1802_v60 = vpop.f32.mrb[27].mxu0  ;;  %v3222_v63 = vsel %vm1871_vm0, %v1858_v53, -1e+30 }
 0x479   : > { %v3205_v61 = vadd.f32 %v3113_v20, %v1800_v54  ;;  %v1803_v62 = vadd.f32 %v1802_v60, %v3089_v58 }
 0x47a   : > { %v3215_v55 = vadd.f32 %v3113_v20, %v1811_v59  ;;  %1896 = vmax.xlane.f32.xlu0 %v3212_v0  ;;  %v1863_v2 = vmax.f32 %v3201_v57, 0.0 }
 0x47b   : > { %v3226_v58 = vadd.f32 %v3113_v20, %v1803_v62  ;;  %1898 = vmax.xlane.f32.xlu1 %v3222_v63  ;;  %v1861_v15 = vmax.f32 %v3205_v61, 0.0 }
 0x47c   : > { %v3233_v3 = vsel %vm1871_vm0, %v1863_v2, -1e+30  ;;  %v1864_v7 = vmax.f32 %v3215_v55, 0.0 }
 0x47d   : > { %v2375_v14 = vpop.f32.mrb[28].mxu0  ;;  %v1862_v21 = vmax.f32 %v3226_v58, 0.0  ;;  %v3260_v34 = vsel %vm1871_vm0, %v1861_v15, -1e+30 }
 0x47e   : > { %v1824_v18 = vadd.f32 %v2375_v14, %v3099_v13  ;;  %v1815_v19 = vpop.f32.mrb[29].mxu0  ;;  %1908 = vmax.xlane.f32.xlu0 %v3233_v3  ;;  %v3243_v6 = vsel %vm1871_vm0, %v1864_v7, -1e+30 }
 0x47f   : > { %v1816_v8 = vadd.f32 %v1815_v19, %v3095_v1  ;;  %v2376_v9 = vpop.f32.mrb[30].mxu0  ;;  %1910 = vmax.xlane.f32.xlu1 %v3243_v6  ;;  %v3267_v1 = vsel %vm1871_vm0, %v1862_v21, -1e+30 }
 0x480   : > { %v1827_v11 = vadd.f32 %v2376_v9, %v3101_v16  ;;  %v1818_v22 = vpop.f32.mrb[31].mxu0  ;;  %v3250_v13 = vadd.f32 %v3113_v20, %v1824_v18 }
 0x481   : > { %v3253_v23 = vadd.f32 %v3113_v20, %v1816_v8  ;;  %v1819_v31 = vadd.f32 %v1818_v22, %v3097_v4 }
 0x482   : > { %1904 = vmax.xlane.f32.xlu0 %v3260_v34  ;;  %v3270_v16 = vadd.f32 %v3113_v20, %v1827_v11  ;;  %v1867_v25 = vmax.f32 %v3250_v13, 0.0 }
 0x483   : > { %v3273_v35 = vadd.f32 %v3113_v20, %v1819_v31  ;;  %1906 = vmax.xlane.f32.xlu1 %v3267_v1  ;;  %v1865_v4 = vmax.f32 %v3253_v23, 0.0 }
 0x484   : > { %v1868_v39 = vmax.f32 %v3270_v16, 0.0  ;;  %v3298_v42 = vsel %vm1871_vm0, %v1867_v25, -1e+30 }
 0x485   : > { %v3281_v36 = vsel %vm1871_vm0, %v1865_v4, -1e+30  ;;  %v1866_v37 = vmax.f32 %v3273_v35, 0.0 }
 0x486   : > { %1912 = vmax.xlane.f32.xlu0 %v3281_v36  ;;  %v3305_v48 = vsel %vm1871_vm0, %v1868_v39, -1e+30 }
 0x487   : > { %v3290_v20 = vsel %vm1871_vm0, %v1866_v37, -1e+30 }
 0x488   : > { %1914 = vmax.xlane.f32.xlu1 %v3290_v20 }
 0x48a   : > { %1916 = vmax.xlane.f32.xlu0 %v3298_v42 }
 0x48c   : > { %1918 = vmax.xlane.f32.xlu1 %v3305_v48 }
 0x4fa   : > { %v3308_v50 = vpop.xlane.xlu1 %1892 }
 0x4fb   : > { %v1922_v51 = vsub.f32 %v3138_v29, %v3308_v50  ;;  %v3312_v54 = vpop.xlane.xlu0 %1888 }
 0x4fc   : > { %v1920_v56 = vsub.f32 %v3146_v32, %v3312_v54 }
 0x4fd   : > { %v1940_v59 = vmul.f32 1.442695, %v1922_v51 }
 0x4fe   : > { %v1936_v60 = vmul.f32 1.442695, %v1920_v56  ;;  %v3316_v62 = vpop.xlane.xlu1 %1894 }
 0x4ff   : > { %2611 = vpow2.f32 %v1940_v59  ;;  %v1923_v14 = vsub.f32 %v3160_v40, %v3316_v62  ;;  %v3320_v18 = vpop.xlane.xlu0 %1890  ;;  %v2019_v10 = vsub.f32 %v1856_v30, %v3316_v62 }
 0x500   : > { %v1921_v19 = vsub.f32 %v3171_v43, %v3320_v18  ;;  %2613 = vpow2.f32 %v1936_v60  ;;  %v2017_v12 = vsub.f32 %v1854_v33, %v3320_v18 }
 0x501   : > { %v1942_v29 = vmul.f32 1.442695, %v1923_v14 }
 0x502   : > { %v1938_v8 = vmul.f32 1.442695, %v1921_v19 }
 0x503   : > { %2615 = vpow2.f32 %v1942_v29  ;;  %v3324_v9 = vpop.xlane.xlu0 %1900 }
 0x504   : > { %v1926_v32 = vsub.f32 %v3185_v17, %v3324_v9  ;;  %v3328_v11 = vpop.xlane.xlu1 %1902  ;;  %2617 = vpow2.f32 %v1938_v8  ;;  %v2022_v24 = vsub.f32 %v1859_v45, %v3324_v9 }
 0x505   : > { %v1927_v40 = vsub.f32 %v3195_v52, %v3328_v11 }
 0x506   : > { %v1948_v22 = vmul.f32 1.442695, %v1926_v32 }
 0x507   : > { %v1950_v31 = vmul.f32 1.442695, %v1927_v40  ;;  %v3332_v51 = vpop.xlane.xlu0 %1896 }
 0x508   : > { %2619 = vpow2.f32 %v1948_v22  ;;  %v1924_v43 = vsub.f32 %v3212_v0, %v3332_v51  ;;  %v3336_v56 = vpop.xlane.xlu1 %1898  ;;  %v2020_v9 = vsub.f32 %v1857_v49, %v3332_v51 }
 0x509   : > { %v2612_v59 = vpop.eup %2611  ;;  %2621 = vpow2.f32 %v1950_v31  ;;  %v1925_v17 = vsub.f32 %v3222_v63, %v3336_v56 }
 0x50a   : > { %v1944_v60 = vmul.f32 1.442695, %v1924_v43  ;;  %v1970_v14 = vsel %vm1871_vm0, %v2612_v59, 0.0  ;;  %v2614_v52 = vpop.eup %2613 }
 0x50b   : > { %v1946_v19 = vmul.f32 1.442695, %v1925_v17  ;;  %1988 = vadd.xlane.f32.xlu0 %v1970_v14  ;;  %v3342_v29 = vpop.xlane.xlu0 %1908  ;;  %v1968_v22 = vsel %vm1871_vm0, %v2614_v52, 0.0 }
 0x50c   : > { %2623 = vpow2.f32 %v1944_v60  ;;  %v1930_v0 = vsub.f32 %v3233_v3, %v3342_v29  ;;  %v3346_v8 = vpop.xlane.xlu1 %1910  ;;  %v2026_v51 = vsub.f32 %v1863_v2, %v3342_v29 }
 0x50d   : > { %v2616_v32 = vpop.eup %2615  ;;  %2625 = vpow2.f32 %v1946_v19  ;;  %v1931_v63 = vsub.f32 %v3243_v6, %v3346_v8 }
 0x50e   : > { %v1956_v40 = vmul.f32 1.442695, %v1930_v0  ;;  %v1971_v31 = vsel %vm1871_vm0, %v2616_v32, 0.0  ;;  %v2618_v43 = vpop.eup %2617 }
 0x50f   : > { %v1958_v59 = vmul.f32 1.442695, %v1931_v63  ;;  %1984 = vadd.xlane.f32.xlu0 %v1968_v22  ;;  %v3354_v17 = vpop.xlane.xlu0 %1904  ;;  %1990 = vadd.xlane.f32.xlu1 %v1971_v31  ;;  %v1969_v19 = vsel %vm1871_vm0, %v2618_v43, 0.0 }
 0x510   : > { %2627 = vpow2.f32 %v1956_v40  ;;  %v1928_v3 = vsub.f32 %v3260_v34, %v3354_v17  ;;  %v3358_v60 = vpop.xlane.xlu1 %1906  ;;  %v2024_v29 = vsub.f32 %v1861_v15, %v3354_v17 }
 0x511   : > { %2629 = vpow2.f32 %v1958_v59  ;;  %v1929_v6 = vsub.f32 %v3267_v1, %v3358_v60 }
 0x512   : > { %v2620_v14 = vpop.eup %2619  ;;  %v1952_v52 = vmul.f32 1.442695, %v1928_v3 }
 0x513   : > { %v2622_v0 = vpop.eup %2621  ;;  %v1954_v32 = vmul.f32 1.442695, %v1929_v6  ;;  %v3364_v63 = vpop.xlane.xlu0 %1912  ;;  %1986 = vadd.xlane.f32.xlu1 %v1969_v19  ;;  %v1974_v40 = vsel %vm1871_vm0, %v2620_v14, 0.0 }
 0x514   : > { %2631 = vpow2.f32 %v1952_v52  ;;  %v1932_v34 = vsub.f32 %v3281_v36, %v3364_v63  ;;  %1996 = vadd.xlane.f32.xlu0 %v1974_v40  ;;  %v1975_v59 = vsel %vm1871_vm0, %v2622_v0, 0.0  ;;  %v2028_v15 = vsub.f32 %v1865_v4, %v3364_v63 }
 0x515   : > { %2633 = vpow2.f32 %v1954_v32  ;;  %v3370_v1 = vpop.xlane.xlu1 %1914 }
 0x516   : > { %v2624_v22 = vpop.eup %2623  ;;  %v1960_v31 = vmul.f32 1.442695, %v1932_v34  ;;  %v1933_v43 = vsub.f32 %v3290_v20, %v3370_v1  ;;  %v2029_v58 = vsub.f32 %v1866_v37, %v3370_v1 }
 0x517   : > { %v2626_v3 = vpop.eup %2625  ;;  %v3376_v6 = vpop.xlane.xlu0 %1916  ;;  %1998 = vadd.xlane.f32.xlu1 %v1975_v59  ;;  %v1972_v14 = vsel %vm1871_vm0, %v2624_v22, 0.0 }
 0x518   : > { %2635 = vpow2.f32 %v1960_v31  ;;  %v1962_v36 = vmul.f32 1.442695, %v1933_v43  ;;  %v1934_v52 = vsub.f32 %v3298_v42, %v3376_v6  ;;  %1992 = vadd.xlane.f32.xlu0 %v1972_v14  ;;  %v1973_v40 = vsel %vm1871_vm0, %v2626_v3, 0.0 }
 0x519   : > { %v3382_v19 = vpop.xlane.xlu1 %1918  ;;  %v2030_v23 = vsub.f32 %v1867_v25, %v3376_v6 }
 0x51a   : > { %v2628_v32 = vpop.eup %2627  ;;  %2637 = vpow2.f32 %v1962_v36  ;;  %v1964_v20 = vmul.f32 1.442695, %v1934_v52  ;;  %v1935_v0 = vsub.f32 %v3305_v48, %v3382_v19  ;;  %v2031_v35 = vsub.f32 %v1868_v39, %v3382_v19 }
 0x51b   : > { %v2630_v34 = vpop.eup %2629  ;;  %1994 = vadd.xlane.f32.xlu1 %v1973_v40  ;;  %v1978_v22 = vsel %vm1871_vm0, %v2628_v32, 0.0 }
 0x51c   : > { %2639 = vpow2.f32 %v1964_v20  ;;  %v1966_v31 = vmul.f32 1.442695, %v1935_v0  ;;  %2004 = vadd.xlane.f32.xlu0 %v1978_v22  ;;  %v1979_v43 = vsel %vm1871_vm0, %v2630_v34, 0.0 }
 0x51e   : > { %v2632_v42 = vpop.eup %2631  ;;  %2641 = vpow2.f32 %v1966_v31 }
 0x51f   : > { %v2634_v59 = vpop.eup %2633  ;;  %2006 = vadd.xlane.f32.xlu1 %v1979_v43  ;;  %v1976_v48 = vsel %vm1871_vm0, %v2632_v42, 0.0 }
 0x520   : > { %2000 = vadd.xlane.f32.xlu0 %v1976_v48  ;;  %v1977_v14 = vsel %vm1871_vm0, %v2634_v59, 0.0 }
 0x522   : > { %v2636_v3 = vpop.eup %2635 }
 0x523   : > { %2002 = vadd.xlane.f32.xlu1 %v1977_v14  ;;  %v1980_v36 = vsel %vm1871_vm0, %v2636_v3, 0.0  ;;  %v2018_v3 = vsub.f32 %v1855_v26, %v3308_v50 }
 0x524   : > { %v2638_v52 = vpop.eup %2637  ;;  %2008 = vadd.xlane.f32.xlu0 %v1980_v36 }
 0x525   : > { %v1981_v32 = vsel %vm1871_vm0, %v2638_v52, 0.0 }
 0x526   : > { %v2640_v20 = vpop.eup %2639 }
 0x527   : > { %2010 = vadd.xlane.f32.xlu1 %v1981_v32  ;;  %v1982_v0 = vsel %vm1871_vm0, %v2640_v20, 0.0 }
 0x528   : > { %v2642_v40 = vpop.eup %2641  ;;  %2012 = vadd.xlane.f32.xlu0 %v1982_v0  ;;  %v2016_v0 = vsub.f32 %v1853_v28, %v3312_v54 }
 0x529   : > { %v1983_v34 = vsel %vm1871_vm0, %v2642_v40, 0.0 }
 0x52b   : > { %2014 = vadd.xlane.f32.xlu1 %v1983_v34 }
 0x598   : > { %v1989_v22 = vpop.xlane.xlu0 %1988 }
 0x599   : > { %2643 = vlog2.f32 %v1989_v22 }
 0x59c   : > { %v1985_v31 = vpop.xlane.xlu0 %1984  ;;  %v1991_v42 = vpop.xlane.xlu1 %1990 }
 0x59d   : > { %2645 = vlog2.f32 %v1985_v31 }
 0x59e   : > { %2647 = vlog2.f32 %v1991_v42 }
 0x5a0   : > { %v1987_v43 = vpop.xlane.xlu1 %1986 }
 0x5a1   : > { %2649 = vlog2.f32 %v1987_v43  ;;  %v1997_v59 = vpop.xlane.xlu0 %1996 }
 0x5a2   : > { %2651 = vlog2.f32 %v1997_v59 }
 0x5a3   : > { %v2644_v48 = vpop.eup %2643 }
 0x5a4   : > { %v2037_v14 = vmul.f32 0.6931472, %v2644_v48  ;;  %v1999_v36 = vpop.xlane.xlu1 %1998  ;;  %v2023_v48 = vsub.f32 %v1860_v47, %v3328_v11 }
 0x5a5   : > { %2653 = vlog2.f32 %v1999_v36  ;;  %v1993_v5 = vpop.xlane.xlu0 %1992 }
 0x5a6   : > { %v2066_v52 = vsub.f32 %v2018_v3, %v2037_v14  ;;  %2655 = vlog2.f32 %v1993_v5  ;;  %v2021_v5 = vsub.f32 %v1858_v53, %v3336_v56 }
 0x5a7   : > { %v2646_v32 = vpop.eup %2645 }
 0x5a8   : > { %v2648_v20 = vpop.eup %2647  ;;  %2082 = vst [vmem:[%s3516_s6 + $0x10] sm:$0xff] %v2066_v52  ;;  %v2033_v40 = vmul.f32 0.6931472, %v2646_v32  ;;  %v1995_v34 = vpop.xlane.xlu1 %1994 }
 0x5a9   : > { %v2039_v26 = vmul.f32 0.6931472, %v2648_v20  ;;  %2657 = vlog2.f32 %v1995_v34  ;;  %v2005_v50 = vpop.xlane.xlu0 %2004 }
 0x5aa   : > { %v2064_v22 = vsub.f32 %v2016_v0, %v2033_v40  ;;  %2659 = vlog2.f32 %v2005_v50  ;;  %v2027_v0 = vsub.f32 %v1864_v7, %v3346_v8  ;;  %v2025_v8 = vsub.f32 %v1862_v21, %v3358_v60 }
 0x5ab   : > { %v2650_v31 = vpop.eup %2649  ;;  %v2067_v42 = vsub.f32 %v2019_v10, %v2039_v26 }
 0x5ac   : > { %v2652_v43 = vpop.eup %2651  ;;  %2080 = vst [vmem:[%s3516_s6] sm:$0xff] %v2064_v22  ;;  %v2035_v28 = vmul.f32 0.6931472, %v2650_v31  ;;  %v2007_v54 = vpop.xlane.xlu1 %2006 }
 0x5ad   : > { %2083 = vst [vmem:[%s3516_s6 + $0x18] sm:$0xff] %v2067_v42  ;;  %v2045_v30 = vmul.f32 0.6931472, %v2652_v43  ;;  %2661 = vlog2.f32 %v2007_v54  ;;  %v2001_v62 = vpop.xlane.xlu0 %2000 }
 0x5ae   : > { %v2065_v59 = vsub.f32 %v2017_v12, %v2035_v28  ;;  %2663 = vlog2.f32 %v2001_v62 }
 0x5af   : > { %v2654_v27 = vpop.eup %2653  ;;  %v2070_v33 = vsub.f32 %v2022_v24, %v2045_v30 }
 0x5b0   : > { %v2656_v18 = vpop.eup %2655  ;;  %2081 = vst [vmem:[%s3516_s6 + $0x8] sm:$0xff] %v2065_v59  ;;  %v2047_v38 = vmul.f32 0.6931472, %v2654_v27  ;;  %v2003_v45 = vpop.xlane.xlu1 %2002 }
 0x5b1   : > { %2086 = vst [vmem:[%s3516_s6 + $0x30] sm:$0xff] %v2070_v33  ;;  %v2041_v3 = vmul.f32 0.6931472, %v2656_v18  ;;  %2665 = vlog2.f32 %v2003_v45  ;;  %v2009_v14 = vpop.xlane.xlu0 %2008 }
 0x5b2   : > { %v2071_v36 = vsub.f32 %v2023_v48, %v2047_v38  ;;  %2667 = vlog2.f32 %v2009_v14 }
 0x5b3   : > { %v2658_v44 = vpop.eup %2657  ;;  %v2068_v47 = vsub.f32 %v2020_v9, %v2041_v3 }
 0x5b4   : > { %v2660_v11 = vpop.eup %2659  ;;  %2087 = vst [vmem:[%s3516_s6 + $0x38] sm:$0xff] %v2071_v36  ;;  %v2043_v41 = vmul.f32 0.6931472, %v2658_v44  ;;  %v2011_v49 = vpop.xlane.xlu1 %2010 }
 0x5b5   : > { %2084 = vst [vmem:[%s3516_s6 + $0x20] sm:$0xff] %v2068_v47  ;;  %v2053_v52 = vmul.f32 0.6931472, %v2660_v11  ;;  %2669 = vlog2.f32 %v2011_v49  ;;  %v2013_v32 = vpop.xlane.xlu0 %2012 }
 0x5b6   : > { %v2069_v20 = vsub.f32 %v2021_v5, %v2043_v41  ;;  %2671 = vlog2.f32 %v2013_v32 }
 0x5b7   : > { %v2662_v46 = vpop.eup %2661  ;;  %v2074_v53 = vsub.f32 %v2026_v51, %v2053_v52 }
 0x5b8   : > { %v2664_v56 = vpop.eup %2663  ;;  %2085 = vst [vmem:[%s3516_s6 + $0x28] sm:$0xff] %v2069_v20  ;;  %v2055_v57 = vmul.f32 0.6931472, %v2662_v46  ;;  %v2015_v2 = vpop.xlane.xlu1 %2014 }
 0x5b9   : > { %2090 = vst [vmem:[%s3516_s6 + $0x50] sm:$0xff] %v2074_v53  ;;  %v2049_v40 = vmul.f32 0.6931472, %v2664_v56  ;;  %2673 = vlog2.f32 %v2015_v2 }
 0x5ba   : > { %v2075_v34 = vsub.f32 %v2027_v0, %v2055_v57 }
 0x5bb   : > { %v2666_v10 = vpop.eup %2665  ;;  %v2072_v55 = vsub.f32 %v2024_v29, %v2049_v40 }
 0x5bc   : > { %v2668_v7 = vpop.eup %2667  ;;  %2091 = vst [vmem:[%s3516_s6 + $0x58] sm:$0xff] %v2075_v34  ;;  %v2051_v61 = vmul.f32 0.6931472, %v2666_v10 }
 0x5bd   : > { %2088 = vst [vmem:[%s3516_s6 + $0x40] sm:$0xff] %v2072_v55  ;;  %v2057_v17 = vmul.f32 0.6931472, %v2668_v7 }
 0x5be   : > { %v2073_v26 = vsub.f32 %v2025_v8, %v2051_v61 }
 0x5bf   : > { %v2670_v50 = vpop.eup %2669  ;;  %v2076_v22 = vsub.f32 %v2028_v15, %v2057_v17 }
 0x5c0   : > { %v2672_v31 = vpop.eup %2671  ;;  %2089 = vst [vmem:[%s3516_s6 + $0x48] sm:$0xff] %v2073_v26  ;;  %v2059_v21 = vmul.f32 0.6931472, %v2670_v50 }
 0x5c1   : > { %2092 = vst [vmem:[%s3516_s6 + $0x60] sm:$0xff] %v2076_v22  ;;  %v2061_v4 = vmul.f32 0.6931472, %v2672_v31 }
 0x5c2   : > { %v2077_v60 = vsub.f32 %v2029_v58, %v2059_v21 }
 0x5c3   : > { %v2674_v63 = vpop.eup %2673  ;;  %v2078_v42 = vsub.f32 %v2030_v23, %v2061_v4 }
 0x5c4   : > { %2093 = vst [vmem:[%s3516_s6 + $0x68] sm:$0xff] %v2077_v60  ;;  %v2063_v37 = vmul.f32 0.6931472, %v2674_v63 }
 0x5c5   : > { %2094 = vst [vmem:[%s3516_s6 + $0x70] sm:$0xff] %v2078_v42 }
 0x5c6   : > { %v2079_v13 = vsub.f32 %v2031_v35, %v2063_v37 }
 0x5c8   : > { %2095 = vst [vmem:[%s3516_s6 + $0x78] sm:$0xff] %v2079_v13 }
 0x5c9 PF: > { %p13_p11 = scmp.ge.s32.totalorder %s2755_s25, 5   ;;  %s3517_s21 = smov %s2693_s22 }
 0x5ca   : > { %s3518_s22 = smov %s2764_s28  ;;  %s3519_s23 = smov %s2755_s25 }
 0x5cb   :  { %15 = sbr.rel (!%p13_p11) target bundleno = 2 (0x2), region = 109 }

</bundles_post_ra>
